<compile_context>
chip_gen: v5e
topology: v5e:2x2
jax: 0.10.0
libtpu: 0.0.40
codegen_flags: <defaults>
</compile_context>

<pallas_src>
import functools

import jax
import jax.numpy as jnp
from jax import lax
from jax.experimental import pallas as pl
from jax.experimental.pallas import tpu as pltpu

IN_EPS = 1e-5     # torch.nn.InstanceNorm2d default eps
LANE = 128


def _round_up(x, m):
    return ((x + m - 1) // m) * m


def _pick_tile_rows(hw, target=512):
    """Rows of the im2col matrix per tile: largest divisor of hw <= target that
    is a multiple of 8 (measured sweet spot 512-1024 rows); whole sample if small."""
    if hw <= 2 * target:
        return hw
    for tr in range(target, 7, -1):
        if hw % tr == 0 and tr % 8 == 0:
            return tr
    return hw  # fallback: whole sample as one tile


def _vmem_limit(estimate_bytes):
    """Only raise the scoped-VMEM limit when the tiles actually need it; cap it
    generation-aware (v7x has 64 MiB physical VMEM vs 128 MiB on v5e/v6e)."""
    if estimate_bytes <= (28 << 20):
        return None  # default scoped limit is plenty
    cap = 64 << 20
    try:
        cap = int(pltpu.get_tpu_info().vmem_capacity_bytes)
    except Exception:
        pass
    return min(int(estimate_bytes * 5 // 4), int(cap * 3 // 4))


# ---------------------------------------------------------------------------
# Pass 1: conv (im2col matmul) + bias + gate, and per-(n, c) sum / sumsq.
# ---------------------------------------------------------------------------
def _conv_gate_kernel(patches_ref, w_ref, bias_ref, gated_ref, sum_ref, sumsq_ref):
    t = pl.program_id(1)

    # bf16 x bf16 -> f32 accumulate on the MXU.
    y = jnp.dot(patches_ref[...], w_ref[...], preferred_element_type=jnp.float32)
    y = y + bias_ref[...]                                  # (TR, Coutp)

    # relu(y) * sigmoid(y); padded channels stay exactly 0 (bias pad is 0).
    g = jnp.maximum(y, 0.0) * (1.0 / (1.0 + jnp.exp(-y)))  # f32
    gated_ref[...] = g.astype(gated_ref.dtype)

    @pl.when(t == 0)
    def _():
        sum_ref[...] = jnp.zeros_like(sum_ref)
        sumsq_ref[...] = jnp.zeros_like(sumsq_ref)

    sum_ref[...] += jnp.sum(g, axis=0, keepdims=True)
    sumsq_ref[...] += jnp.sum(g * g, axis=0, keepdims=True)


# ---------------------------------------------------------------------------
# Pass 2: instance-norm folded into one scale/shift per (n, c), plus affine.
# ---------------------------------------------------------------------------
def _instnorm_kernel(gated_ref, sum_ref, sumsq_ref, gamma_ref, beta_ref, out_ref,
                     *, inv_hw, eps):
    mean = sum_ref[...] * inv_hw                           # (1, Coutp)
    var = jnp.maximum(sumsq_ref[...] * inv_hw - mean * mean, 0.0)
    scale = gamma_ref[...] * lax.rsqrt(var + eps)          # EUP rsqrt, tiny vector
    shift = beta_ref[...] - mean * scale
    out_ref[...] = (gated_ref[...] * scale + shift).astype(out_ref.dtype)


def _im2col(x, kh, kw, padding, stride):
    """x: (N, Cin, H, W) -> patches (N, OH*OW, Cin*kh*kw), K ordered (cin, kh, kw)."""
    n, cin, h, w = x.shape
    oh = (h + 2 * padding - kh) // stride + 1
    ow = (w + 2 * padding - kw) // stride + 1
    xp = jnp.pad(x, ((0, 0), (0, 0), (padding, padding), (padding, padding)))
    pieces = []
    for i in range(kh):
        for j in range(kw):
            pieces.append(xp[:, :, i:i + stride * oh:stride, j:j + stride * ow:stride])
    stacked = jnp.stack(pieces, axis=0).reshape(kh, kw, n, cin, oh, ow)
    stacked = jnp.transpose(stacked, (2, 4, 5, 3, 0, 1))   # (n, oh, ow, cin, kh, kw)
    return stacked.reshape(n, oh * ow, cin * kh * kw), oh, ow


@functools.partial(jax.jit, static_argnames=("kernel_size", "padding", "stride"))
def gated_block(x, weight, bias, gamma, beta, *, kernel_size, padding, stride):
    """x: (N, Cin, H, W) NCHW; weight: (Cout, Cin, KH, KW); returns NCHW f32."""
    n, cin, h, w = x.shape
    cout = weight.shape[0]
    kh = kw = kernel_size
    coutp = _round_up(max(cout, 1), LANE)                  # lane-dense output width

    # bf16 MXU inputs (halves the dominant HBM patches stream); f32 elsewhere.
    patches, oh, ow = _im2col(x.astype(jnp.bfloat16), kh, kw, padding, stride)
    hw = oh * ow
    k = patches.shape[-1]

    w2d = jnp.zeros((k, coutp), jnp.bfloat16).at[:, :cout].set(
        weight.reshape(cout, k).T.astype(jnp.bfloat16))
    b2d = jnp.zeros((1, coutp), jnp.float32).at[:, :cout].set(
        bias.reshape(1, cout).astype(jnp.float32))
    g2d = jnp.zeros((1, coutp), jnp.float32).at[:, :cout].set(
        gamma.reshape(1, cout).astype(jnp.float32))
    be2d = jnp.zeros((1, coutp), jnp.float32).at[:, :cout].set(
        beta.reshape(1, cout).astype(jnp.float32))

    tr = _pick_tile_rows(hw)
    num_t = hw // tr
    inv_hw = 1.0 / float(hw)

    # -------- pass 1: conv + gate tiles, accumulate per-(n, c) stats ----------
    vmem_a = 2 * (tr * k * 2 + k * coutp * 2 + coutp * 4
                  + tr * coutp * 4 + 2 * coutp * 4)
    gated, s1, s2 = pl.pallas_call(
        _conv_gate_kernel,
        out_shape=(
            jax.ShapeDtypeStruct((n, hw, coutp), jnp.float32),
            jax.ShapeDtypeStruct((n, 1, coutp), jnp.float32),
            jax.ShapeDtypeStruct((n, 1, coutp), jnp.float32),
        ),
        grid_spec=pltpu.PrefetchScalarGridSpec(
            num_scalar_prefetch=0,
            grid=(n, num_t),
            in_specs=[
                pl.BlockSpec((None, tr, k), lambda i, t: (i, t, 0)),
                pl.BlockSpec((k, coutp), lambda i, t: (0, 0)),
                pl.BlockSpec((1, coutp), lambda i, t: (0, 0)),
            ],
            out_specs=(
                pl.BlockSpec((None, tr, coutp), lambda i, t: (i, t, 0)),
                pl.BlockSpec((None, 1, coutp), lambda i, t: (i, 0, 0)),
                pl.BlockSpec((None, 1, coutp), lambda i, t: (i, 0, 0)),
            ),
        ),
        compiler_params=pltpu.CompilerParams(
            dimension_semantics=("parallel", "arbitrary"),
            vmem_limit_bytes=_vmem_limit(vmem_a),
        ),
    )(patches, w2d, b2d)

    # -------- pass 2: normalize (folded scale/shift) ---------------------------
    vmem_b = 2 * (2 * tr * coutp * 4 + 4 * coutp * 4)
    out_flat = pl.pallas_call(
        functools.partial(_instnorm_kernel, inv_hw=inv_hw, eps=IN_EPS),
        out_shape=jax.ShapeDtypeStruct((n, hw, coutp), jnp.float32),
        grid_spec=pltpu.PrefetchScalarGridSpec(
            num_scalar_prefetch=0,
            grid=(n, num_t),
            in_specs=[
                pl.BlockSpec((None, tr, coutp), lambda i, t: (i, t, 0)),
                pl.BlockSpec((None, 1, coutp), lambda i, t: (i, 0, 0)),
                pl.BlockSpec((None, 1, coutp), lambda i, t: (i, 0, 0)),
                pl.BlockSpec((1, coutp), lambda i, t: (0, 0)),
                pl.BlockSpec((1, coutp), lambda i, t: (0, 0)),
            ],
            out_specs=pl.BlockSpec((None, tr, coutp), lambda i, t: (i, t, 0)),
        ),
        compiler_params=pltpu.CompilerParams(
            dimension_semantics=("parallel", "parallel"),
            vmem_limit_bytes=_vmem_limit(vmem_b),
        ),
    )(gated, s1, s2, g2d, be2d)

    # (N, OH*OW, Coutp) -> slice padded channels -> (N, OH, OW, Cout) -> NCHW.
    # (NHWC consumers could skip the final transpose.)
    out = out_flat[:, :, :cout].reshape(n, oh, ow, cout)
    return jnp.transpose(out, (0, 3, 1, 2))


def _reference(x, weight, bias, gamma, beta, *, padding, stride):
    # Apply the same bf16 input quantization as the kernel (bf16 MXU inputs,
    # f32 accumulation), so only accumulation-order rounding differs.
    xb = x.astype(jnp.bfloat16).astype(jnp.float32)
    wb = weight.astype(jnp.bfloat16).astype(jnp.float32)
    conv = lax.conv_general_dilated(
        xb, wb, window_strides=(stride, stride),
        padding=[(padding, padding), (padding, padding)],
        dimension_numbers=("NCHW", "OIHW", "NCHW"),
    ) + bias.reshape(1, -1, 1, 1)
    g = jnp.maximum(conv, 0.0) * (1.0 / (1.0 + jnp.exp(-conv)))   # relu * sigmoid
    mean = jnp.mean(g, axis=(2, 3), keepdims=True)                 # instance norm
    var = jnp.mean((g - mean) ** 2, axis=(2, 3), keepdims=True)
    y = (g - mean) * lax.rsqrt(var + IN_EPS)
    return y * gamma.reshape(1, -1, 1, 1) + beta.reshape(1, -1, 1, 1)


if __name__ == "__main__":
    # Gated_block(in_channels=4, out_channels=8, kernel_size=3, padding=1,
    #             stride=1, b_norm=True, affine=True, dropout=None)
    N, CIN, H, W = 2, 4, 16, 16
    COUT, KS, PAD, STRIDE = 8, 3, 1, 1

    key = jax.random.PRNGKey(0)
    kx, kw_, kb = jax.random.split(key, 3)

    x = jax.random.normal(kx, (N, CIN, H, W), dtype=jnp.float32)

    # Deterministic param init mirroring nn.Conv2d (kaiming-uniform-ish bound)
    fan_in = CIN * KS * KS
    bound = 1.0 / (fan_in ** 0.5)
    weight = jax.random.uniform(kw_, (COUT, CIN, KS, KS), jnp.float32, -bound, bound)
    bias = jax.random.uniform(kb, (COUT,), jnp.float32, -bound, bound)
    # nn.InstanceNorm2d affine init: weight (gamma) = 1, bias (beta) = 0
    gamma = jnp.ones((COUT,), jnp.float32)
    beta = jnp.zeros((COUT,), jnp.float32)

    out = gated_block(x, weight, bias, gamma, beta,
                      kernel_size=KS, padding=PAD, stride=STRIDE)
    out = jax.block_until_ready(out)

    ref = _reference(x, weight, bias, gamma, beta, padding=PAD, stride=STRIDE)
    assert out.shape == (N, COUT, H, W), out.shape
    max_err = float(jnp.max(jnp.abs(out - ref)))
    assert jnp.allclose(out, ref, atol=2e-3, rtol=2e-3), max_err

    print("KERNEL_OK")
</pallas_src>

<mosaic_0001>
module attributes {stable_mosaic.version = 11 : i64} {
  func.func @_instnorm_kernel(%arg0: i32, %arg1: i32, %arg2: memref<1x256x128xf32, #tpu.memory_space<vmem>>, %arg3: memref<1x1x128xf32, #tpu.memory_space<vmem>>, %arg4: memref<1x1x128xf32, #tpu.memory_space<vmem>>, %arg5: memref<1x128xf32, #tpu.memory_space<vmem>>, %arg6: memref<1x128xf32, #tpu.memory_space<vmem>>, %arg7: memref<1x256x128xf32, #tpu.memory_space<vmem>>) attributes {dimension_semantics = [#tpu.dimension_semantics<parallel>, #tpu.dimension_semantics<parallel>], iteration_bounds = array<i64: 2, 1>, scalar_prefetch = 0 : i64, scratch_operands = 0 : i64, tpu.core_type = #tpu.core_type<tc>, window_params = [{transform_indices = @transform_0, window_bounds = array<i64: 1, 256, 128>}, {transform_indices = @transform_1, window_bounds = array<i64: 1, 1, 128>}, {transform_indices = @transform_2, window_bounds = array<i64: 1, 1, 128>}, {pipeline_mode = #tpu.pipeline_mode<synchronous>, transform_indices = @transform_3, window_bounds = array<i64: 1, 128>}, {pipeline_mode = #tpu.pipeline_mode<synchronous>, transform_indices = @transform_4, window_bounds = array<i64: 1, 128>}, {transform_indices = @transform_5, window_bounds = array<i64: 1, 256, 128>}]} {
    %c0 = arith.constant 0 : index
    %c0_0 = arith.constant 0 : index
    %c0_1 = arith.constant 0 : index
    %0 = vector.load %arg3[%c0, %c0_0, %c0_1] : memref<1x1x128xf32, #tpu.memory_space<vmem>>, vector<1x1x128xf32>
    %1 = vector.shape_cast %0 : vector<1x1x128xf32> to vector<1x128xf32>
    %cst = arith.constant 3.906250e-03 : f32
    %2 = vector.broadcast %cst : f32 to vector<1x128xf32>
    %3 = arith.mulf %1, %2 : vector<1x128xf32>
    %c0_2 = arith.constant 0 : index
    %c0_3 = arith.constant 0 : index
    %c0_4 = arith.constant 0 : index
    %4 = vector.load %arg4[%c0_2, %c0_3, %c0_4] : memref<1x1x128xf32, #tpu.memory_space<vmem>>, vector<1x1x128xf32>
    %5 = vector.shape_cast %4 : vector<1x1x128xf32> to vector<1x128xf32>
    %cst_5 = arith.constant 3.906250e-03 : f32
    %6 = vector.broadcast %cst_5 : f32 to vector<1x128xf32>
    %7 = arith.mulf %5, %6 : vector<1x128xf32>
    %8 = arith.mulf %3, %3 : vector<1x128xf32>
    %9 = arith.subf %7, %8 : vector<1x128xf32>
    %cst_6 = arith.constant 0.000000e+00 : f32
    %10 = vector.broadcast %cst_6 : f32 to vector<1x128xf32>
    %11 = arith.maximumf %9, %10 : vector<1x128xf32>
    %c0_7 = arith.constant 0 : index
    %c0_8 = arith.constant 0 : index
    %12 = vector.load %arg5[%c0_7, %c0_8] : memref<1x128xf32, #tpu.memory_space<vmem>>, vector<1x128xf32>
    %cst_9 = arith.constant 9.99999974E-6 : f32
    %13 = vector.broadcast %cst_9 : f32 to vector<1x128xf32>
    %14 = arith.addf %11, %13 : vector<1x128xf32>
    %15 = math.rsqrt %14 : vector<1x128xf32>
    %16 = arith.mulf %12, %15 : vector<1x128xf32>
    %c0_10 = arith.constant 0 : index
    %c0_11 = arith.constant 0 : index
    %17 = vector.load %arg6[%c0_10, %c0_11] : memref<1x128xf32, #tpu.memory_space<vmem>>, vector<1x128xf32>
    %18 = arith.mulf %3, %16 : vector<1x128xf32>
    %19 = arith.subf %17, %18 : vector<1x128xf32>
    %c0_12 = arith.constant 0 : index
    %c0_13 = arith.constant 0 : index
    %c0_14 = arith.constant 0 : index
    %20 = vector.load %arg2[%c0_12, %c0_13, %c0_14] : memref<1x256x128xf32, #tpu.memory_space<vmem>>, vector<1x256x128xf32>
    %21 = vector.shape_cast %20 : vector<1x256x128xf32> to vector<256x128xf32>
    %22 = vector.broadcast %16 : vector<1x128xf32> to vector<256x128xf32>
    %23 = arith.mulf %21, %22 : vector<256x128xf32>
    %24 = vector.broadcast %19 : vector<1x128xf32> to vector<256x128xf32>
    %25 = arith.addf %23, %24 : vector<256x128xf32>
    %c0_15 = arith.constant 0 : index
    %c0_16 = arith.constant 0 : index
    %c0_17 = arith.constant 0 : index
    %26 = vector.load %arg7[%c0_15, %c0_16, %c0_17] : memref<1x256x128xf32, #tpu.memory_space<vmem>>, vector<1x256x128xf32>
    %27 = vector.shape_cast %26 : vector<1x256x128xf32> to vector<256x128xf32>
    %28 = vector.shape_cast %25 : vector<256x128xf32> to vector<1x256x128xf32>
    tpu.vector_store %arg7[%c0_15, %c0_16, %c0_17], %28 {strides = array<i32>} : memref<1x256x128xf32, #tpu.memory_space<vmem>>, vector<1x256x128xf32>,
    return
  }
  func.func @transform_0(%arg0: i32, %arg1: i32) -> (i32, i32, i32) {
    %c0_i32 = arith.constant 0 : i32
    %c0_i32_0 = arith.constant 0 : i32
    return %arg0, %arg1, %c0_i32 : i32, i32, i32
  }
  func.func @transform_1(%arg0: i32, %arg1: i32) -> (i32, i32, i32) {
    %c0_i32 = arith.constant 0 : i32
    %c0_i32_0 = arith.constant 0 : i32
    %c0_i32_1 = arith.constant 0 : i32
    return %arg0, %c0_i32, %c0_i32_0 : i32, i32, i32
  }
  func.func @transform_2(%arg0: i32, %arg1: i32) -> (i32, i32, i32) {
    %c0_i32 = arith.constant 0 : i32
    %c0_i32_0 = arith.constant 0 : i32
    %c0_i32_1 = arith.constant 0 : i32
    return %arg0, %c0_i32, %c0_i32_0 : i32, i32, i32
  }
  func.func @transform_3(%arg0: i32, %arg1: i32) -> (i32, i32) {
    %c0_i32 = arith.constant 0 : i32
    %c0_i32_0 = arith.constant 0 : i32
    %c0_i32_1 = arith.constant 0 : i32
    return %c0_i32, %c0_i32_0 : i32, i32
  }
  func.func @transform_4(%arg0: i32, %arg1: i32) -> (i32, i32) {
    %c0_i32 = arith.constant 0 : i32
    %c0_i32_0 = arith.constant 0 : i32
    %c0_i32_1 = arith.constant 0 : i32
    return %c0_i32, %c0_i32_0 : i32, i32
  }
  func.func @transform_5(%arg0: i32, %arg1: i32) -> (i32, i32, i32) {
    %c0_i32 = arith.constant 0 : i32
    %c0_i32_0 = arith.constant 0 : i32
    return %arg0, %arg1, %c0_i32 : i32, i32, i32
  }
}

module attributes {stable_mosaic.version = 11 : i64} {
  func.func @_conv_gate_kernel(%arg0: i32, %arg1: i32, %arg2: memref<1x256x36xbf16, #tpu.memory_space<vmem>>, %arg3: memref<36x128xbf16, #tpu.memory_space<vmem>>, %arg4: memref<1x128xf32, #tpu.memory_space<vmem>>, %arg5: memref<1x256x128xf32, #tpu.memory_space<vmem>>, %arg6: memref<1x1x128xf32, #tpu.memory_space<vmem>>, %arg7: memref<1x1x128xf32, #tpu.memory_space<vmem>>) attributes {dimension_semantics = [#tpu.dimension_semantics<parallel>, #tpu.dimension_semantics<arbitrary>], iteration_bounds = array<i64: 2, 1>, scalar_prefetch = 0 : i64, scratch_operands = 0 : i64, tpu.core_type = #tpu.core_type<tc>, window_params = [{transform_indices = @transform_0, window_bounds = array<i64: 1, 256, 36>}, {pipeline_mode = #tpu.pipeline_mode<synchronous>, transform_indices = @transform_1, window_bounds = array<i64: 36, 128>}, {pipeline_mode = #tpu.pipeline_mode<synchronous>, transform_indices = @transform_2, window_bounds = array<i64: 1, 128>}, {transform_indices = @transform_3, window_bounds = array<i64: 1, 256, 128>}, {transform_indices = @transform_4, window_bounds = array<i64: 1, 1, 128>}, {transform_indices = @transform_5, window_bounds = array<i64: 1, 1, 128>}]} {
    %c0 = arith.constant 0 : index
    %c0_0 = arith.constant 0 : index
    %c0_1 = arith.constant 0 : index
    %0 = vector.load %arg2[%c0, %c0_0, %c0_1] : memref<1x256x36xbf16, #tpu.memory_space<vmem>>, vector<1x256x36xbf16>
    %1 = vector.shape_cast %0 : vector<1x256x36xbf16> to vector<256x36xbf16>
    %c0_2 = arith.constant 0 : index
    %c0_3 = arith.constant 0 : index
    %2 = vector.load %arg3[%c0_2, %c0_3] : memref<36x128xbf16, #tpu.memory_space<vmem>>, vector<36x128xbf16>
    %cst = arith.constant dense<0.000000e+00> : vector<256x128xf32>
    %3 = tpu.matmul %1, %2, %cst {dimension_numbers = #tpu.dot_dimension_numbers<[1], [0], [0], [1], [0, 0, 1, 1], [], []>} : vector<256x36xbf16>, vector<36x128xbf16>, vector<256x128xf32> -> vector<256x128xf32>
    %c0_4 = arith.constant 0 : index
    %c0_5 = arith.constant 0 : index
    %4 = vector.load %arg4[%c0_4, %c0_5] : memref<1x128xf32, #tpu.memory_space<vmem>>, vector<1x128xf32>
    %5 = vector.broadcast %4 : vector<1x128xf32> to vector<256x128xf32>
    %6 = arith.addf %3, %5 : vector<256x128xf32>
    %cst_6 = arith.constant 0.000000e+00 : f32
    %7 = vector.broadcast %cst_6 : f32 to vector<256x128xf32>
    %8 = arith.maximumf %6, %7 : vector<256x128xf32>
    %cst_7 = arith.constant 0.000000e+00 : f32
    %9 = vector.broadcast %cst_7 : f32 to vector<256x128xf32>
    %10 = arith.subf %9, %6 : vector<256x128xf32>
    %11 = math.exp %10 : vector<256x128xf32>
    %cst_8 = arith.constant 1.000000e+00 : f32
    %12 = vector.broadcast %cst_8 : f32 to vector<256x128xf32>
    %13 = arith.addf %12, %11 : vector<256x128xf32>
    %cst_9 = arith.constant 1.000000e+00 : f32
    %14 = vector.broadcast %cst_9 : f32 to vector<256x128xf32>
    %15 = arith.divf %14, %13 : vector<256x128xf32>
    %16 = arith.mulf %8, %15 : vector<256x128xf32>
    %c0_10 = arith.constant 0 : index
    %c0_11 = arith.constant 0 : index
    %c0_12 = arith.constant 0 : index
    %17 = vector.load %arg5[%c0_10, %c0_11, %c0_12] : memref<1x256x128xf32, #tpu.memory_space<vmem>>, vector<1x256x128xf32>
    %18 = vector.shape_cast %17 : vector<1x256x128xf32> to vector<256x128xf32>
    %19 = vector.shape_cast %16 : vector<256x128xf32> to vector<1x256x128xf32>
    tpu.vector_store %arg5[%c0_10, %c0_11, %c0_12], %19 {strides = array<i32>} : memref<1x256x128xf32, #tpu.memory_space<vmem>>, vector<1x256x128xf32>,
    %c0_i32 = arith.constant 0 : i32
    %20 = arith.cmpi eq, %arg1, %c0_i32 : i32
    %21 = arith.extui %20 : i1 to i32
    %c0_i32_13 = arith.constant 0 : i32
    %22 = arith.cmpi ne, %21, %c0_i32_13 : i32
    scf.if %22 {
      %cst_28 = arith.constant 0.000000e+00 : f32
      %40 = vector.broadcast %cst_28 : f32 to vector<1x128xf32>
      %c0_29 = arith.constant 0 : index
      %c0_30 = arith.constant 0 : index
      %c0_31 = arith.constant 0 : index
      %41 = vector.load %arg6[%c0_29, %c0_30, %c0_31] : memref<1x1x128xf32, #tpu.memory_space<vmem>>, vector<1x1x128xf32>
      %42 = vector.shape_cast %41 : vector<1x1x128xf32> to vector<1x128xf32>
      %43 = vector.shape_cast %40 : vector<1x128xf32> to vector<1x1x128xf32>
      tpu.vector_store %arg6[%c0_29, %c0_30, %c0_31], %43 {strides = array<i32>} : memref<1x1x128xf32, #tpu.memory_space<vmem>>, vector<1x1x128xf32>,
      %cst_32 = arith.constant 0.000000e+00 : f32
      %44 = vector.broadcast %cst_32 : f32 to vector<1x128xf32>
      %c0_33 = arith.constant 0 : index
      %c0_34 = arith.constant 0 : index
      %c0_35 = arith.constant 0 : index
      %45 = vector.load %arg7[%c0_33, %c0_34, %c0_35] : memref<1x1x128xf32, #tpu.memory_space<vmem>>, vector<1x1x128xf32>
      %46 = vector.shape_cast %45 : vector<1x1x128xf32> to vector<1x128xf32>
      %47 = vector.shape_cast %44 : vector<1x128xf32> to vector<1x1x128xf32>
      tpu.vector_store %arg7[%c0_33, %c0_34, %c0_35], %47 {strides = array<i32>} : memref<1x1x128xf32, #tpu.memory_space<vmem>>, vector<1x1x128xf32>,
    } else {
    }
    %c0_14 = arith.constant 0 : index
    %c0_15 = arith.constant 0 : index
    %c0_16 = arith.constant 0 : index
    %23 = vector.load %arg6[%c0_14, %c0_15, %c0_16] : memref<1x1x128xf32, #tpu.memory_space<vmem>>, vector<1x1x128xf32>
    %24 = vector.shape_cast %23 : vector<1x1x128xf32> to vector<1x128xf32>
    %cst_17 = arith.constant dense<0.000000e+00> : vector<128xf32>
    %25 = vector.multi_reduction <add>, %16, %cst_17 [0] : vector<256x128xf32> to vector<128xf32>
    %26 = vector.shape_cast %25 : vector<128xf32> to vector<1x128xf32>
    %27 = arith.addf %24, %26 : vector<1x128xf32>
    %c0_18 = arith.constant 0 : index
    %c0_19 = arith.constant 0 : index
    %c0_20 = arith.constant 0 : index
    %28 = vector.load %arg6[%c0_18, %c0_19, %c0_20] : memref<1x1x128xf32, #tpu.memory_space<vmem>>, vector<1x1x128xf32>
    %29 = vector.shape_cast %28 : vector<1x1x128xf32> to vector<1x128xf32>
    %30 = vector.shape_cast %27 : vector<1x128xf32> to vector<1x1x128xf32>
    tpu.vector_store %arg6[%c0_18, %c0_19, %c0_20], %30 {strides = array<i32>} : memref<1x1x128xf32, #tpu.memory_space<vmem>>, vector<1x1x128xf32>,
    %c0_21 = arith.constant 0 : index
    %c0_22 = arith.constant 0 : index
    %c0_23 = arith.constant 0 : index
    %31 = vector.load %arg7[%c0_21, %c0_22, %c0_23] : memref<1x1x128xf32, #tpu.memory_space<vmem>>, vector<1x1x128xf32>
    %32 = vector.shape_cast %31 : vector<1x1x128xf32> to vector<1x128xf32>
    %33 = arith.mulf %16, %16 : vector<256x128xf32>
    %cst_24 = arith.constant dense<0.000000e+00> : vector<128xf32>
    %34 = vector.multi_reduction <add>, %33, %cst_24 [0] : vector<256x128xf32> to vector<128xf32>
    %35 = vector.shape_cast %34 : vector<128xf32> to vector<1x128xf32>
    %36 = arith.addf %32, %35 : vector<1x128xf32>
    %c0_25 = arith.constant 0 : index
    %c0_26 = arith.constant 0 : index
    %c0_27 = arith.constant 0 : index
    %37 = vector.load %arg7[%c0_25, %c0_26, %c0_27] : memref<1x1x128xf32, #tpu.memory_space<vmem>>, vector<1x1x128xf32>
    %38 = vector.shape_cast %37 : vector<1x1x128xf32> to vector<1x128xf32>
    %39 = vector.shape_cast %36 : vector<1x128xf32> to vector<1x1x128xf32>
    tpu.vector_store %arg7[%c0_25, %c0_26, %c0_27], %39 {strides = array<i32>} : memref<1x1x128xf32, #tpu.memory_space<vmem>>, vector<1x1x128xf32>,
    return
  }
  func.func @transform_0(%arg0: i32, %arg1: i32) -> (i32, i32, i32) {
    %c0_i32 = arith.constant 0 : i32
    %c0_i32_0 = arith.constant 0 : i32
    return %arg0, %arg1, %c0_i32 : i32, i32, i32
  }
  func.func @transform_1(%arg0: i32, %arg1: i32) -> (i32, i32) {
    %c0_i32 = arith.constant 0 : i32
    %c0_i32_0 = arith.constant 0 : i32
    %c0_i32_1 = arith.constant 0 : i32
    return %c0_i32, %c0_i32_0 : i32, i32
  }
  func.func @transform_2(%arg0: i32, %arg1: i32) -> (i32, i32) {
    %c0_i32 = arith.constant 0 : i32
    %c0_i32_0 = arith.constant 0 : i32
    %c0_i32_1 = arith.constant 0 : i32
    return %c0_i32, %c0_i32_0 : i32, i32
  }
  func.func @transform_3(%arg0: i32, %arg1: i32) -> (i32, i32, i32) {
    %c0_i32 = arith.constant 0 : i32
    %c0_i32_0 = arith.constant 0 : i32
    return %arg0, %arg1, %c0_i32 : i32, i32, i32
  }
  func.func @transform_4(%arg0: i32, %arg1: i32) -> (i32, i32, i32) {
    %c0_i32 = arith.constant 0 : i32
    %c0_i32_0 = arith.constant 0 : i32
    %c0_i32_1 = arith.constant 0 : i32
    return %arg0, %c0_i32, %c0_i32_0 : i32, i32, i32
  }
  func.func @transform_5(%arg0: i32, %arg1: i32) -> (i32, i32, i32) {
    %c0_i32 = arith.constant 0 : i32
    %c0_i32_0 = arith.constant 0 : i32
    %c0_i32_1 = arith.constant 0 : i32
    return %arg0, %c0_i32, %c0_i32_0 : i32, i32, i32
  }
}

</mosaic_0001>

<bundles_post_ra>
// kernel: gated_block.3
= control target key start
LH: loop header
LB: loop body
LE: loop exit
PB: predicated region body
PF: predicated region fallthrough
CT: control target
= control target key end

     0   :  { %s647_s18 = smov 0   ;;  %s649_s19 = smov 0   ;;  %s833_s0 = inlined_call_operand.vmem [shape: f32[2,256,128], index: 0, kind: input, shape index: {}]   ;;  %s834_s1 = inlined_call_operand.vmem [shape: f32[2,1,128], index: 1, kind: input, shape index: {}]   ;;  %s835_s2 = inlined_call_operand.vmem [shape: f32[2,1,128], index: 2, kind: input, shape index: {}]   ;;  %s836_s3 = inlined_call_operand.vmem [shape: f32[1,128], index: 3, kind: input, shape index: {}]   ;;  %s837_s4 = inlined_call_operand.vmem [shape: f32[1,128], index: 4, kind: input, shape index: {}]   ;;  %s838_s5 = inlined_call_operand.vmem [shape: f32[2,256,128], index: 5, kind: output, shape index: {}]  }
   0x1   :  { %s651_s20 = smov 0  }
   0x2 LB: > { %s27_s21 = sadd.s32 1, %s611_s19  ;;  %p558_p0 = scmp.ge.s32.totalorder %s615_s20, 1  ;;  %s615_s20 = sphi %s651_s20, %s15_s20   ;;  %s611_s19 = sphi %s649_s19, %s840_s19   ;;  %s607_s18 = sphi %s647_s18, %s839_s18  }
   0x3   : > { %p29_p1 = scmp.ge.s32.totalorder %s27_s21, 2  ;;  %p224_p2 = scmp.lt.s32.totalorder %s615_s20, 3 }
   0x5   : > { %s842_s21 = smov (%p29_p1, %s27_s21), 0  ;;  %p225_p3 = pnand %p558_p0, %p224_p2 }
   0x6   : > { %p267_p4 = scmp.lt.s32.totalorder (!%p225_p3), %s607_s18, 1 }
   0x7   : > { %228 = sbr.rel (%p225_p3) target bundleno = 85 (0x55), region = 40 }
   0xc   : > { %s844_s18 = smov (!%p267_p4, %s607_s18), 1  ;;  %v299_v13 = vld [vmem:[%s836_s3] sm:$0x1] }
   0xd   : > { %s278_s24 = scalar_lea.vmem %s834_s1, %s844_s18  ;;  %s281_s27 = scalar_lea.vmem %s835_s2, %s844_s18  ;;  %v312_v17 = vld [vmem:[%s837_s4] sm:$0x1] }
   0xe   : > { %v292_v0 = vld [vmem:[%s278_s24] sm:$0x1]  ;;  %s565_s28 = sshll.u32 %s844_s18, 8 }
   0xf   : > { %v293_v1 = vmul.f32 0.00390625, %v292_v0  ;;  %v294_v2 = vld [vmem:[%s281_s27] sm:$0x1]  ;;  %s682_s8 = scalar_lea.vmem %s833_s0, %s565_s28  ;;  %s707_s13 = scalar_lea.vmem %s838_s5, %s565_s28 }
  0x10   : > { %v295_v3 = vmul.f32 0.00390625, %v294_v2  ;;  %v315_v18 = vld [vmem:[%s682_s8] sm:$0xff]  ;;  %v316_v19 = vld [vmem:[%s682_s8 + $0x8] sm:$0xff]  ;;  %v317_v20 = vld [vmem:[%s682_s8 + $0x10] sm:$0xff] }
  0x11   : > { %v296_v4 = vmul.f32 %v293_v1, %v293_v1  ;;  %v318_v23 = vld [vmem:[%s682_s8 + $0x18] sm:$0xff]  ;;  %v319_v24 = vld [vmem:[%s682_s8 + $0x20] sm:$0xff]  ;;  %v320_v29 = vld [vmem:[%s682_s8 + $0x28] sm:$0xff] }
  0x12   : > { %v321_v31 = vld [vmem:[%s682_s8 + $0x30] sm:$0xff]  ;;  %v322_v34 = vld [vmem:[%s682_s8 + $0x38] sm:$0xff]  ;;  %v323_v36 = vld [vmem:[%s682_s8 + $0x40] sm:$0xff] }
  0x13   : > { %v297_v5 = vsub.f32 %v295_v3, %v296_v4  ;;  %v324_v41 = vld [vmem:[%s682_s8 + $0x48] sm:$0xff]  ;;  %v325_v44 = vld [vmem:[%s682_s8 + $0x50] sm:$0xff]  ;;  %v326_v47 = vld [vmem:[%s682_s8 + $0x58] sm:$0xff] }
  0x14   : > { %v327_v50 = vld [vmem:[%s682_s8 + $0x60] sm:$0xff]  ;;  %v328_v53 = vld [vmem:[%s682_s8 + $0x68] sm:$0xff]  ;;  %v329_v56 = vld [vmem:[%s682_s8 + $0x70] sm:$0xff] }
  0x15   : > { %v298_v6 = vmax.f32 %v297_v5, 0.0  ;;  %v330_v59 = vld [vmem:[%s682_s8 + $0x78] sm:$0xff]  ;;  %v331_v62 = vld [vmem:[%s682_s8 + $0x80] sm:$0xff]  ;;  %v333_v4 = vld [vmem:[%s682_s8 + $0x90] sm:$0xff] }
  0x17   : > { %v300_v7 = vadd.f32 1e-05, %v298_v6 }
  0x19   : > { %591 = vrsqrt.f32 %v300_v7  ;;  %vm307_vm0 = vweird.f32 %v300_v7 }
  0x1f   : > { %v592_v8 = vpop.eup %591 }
  0x20   : > { %v302_v9 = vmul.f32 %v592_v8, %v300_v7  ;;  %vm308_vm1 = vweird.f32 %v592_v8  ;;  %v334_v7 = vld [vmem:[%s682_s8 + $0x98] sm:$0xff] }
  0x21   : > { %vm309_vm2 = vmor %vm307_vm0, %vm308_vm1 }
  0x22   : > { %v303_v10 = vmul.f32 %v592_v8, %v302_v9 }
  0x24   : > { %v304_v11 = vmul.f32 0.5, %v303_v10  ;;  %v335_v10 = vld [vmem:[%s682_s8 + $0xa0] sm:$0xff] }
  0x26   : > { %v305_v12 = vsub.f32 1.5, %v304_v11 }
  0x28   : > { %v306_v14 = vmul.f32 %v592_v8, %v305_v12 }
  0x2a   : > { %v310_v15 = vsel %vm309_vm2, %v592_v8, %v306_v14 }
  0x2b   : > { %v311_v16 = vmul.f32 %v310_v15, %v299_v13  ;;  %v336_v13 = vld [vmem:[%s682_s8 + $0xa8] sm:$0xff] }
  0x2d   : > { %v313_v21 = vmul.f32 %v311_v16, %v293_v1  ;;  %v690_v22 = vperm.slane %v311_v16, 0  ;;  %v332_v1 = vld [vmem:[%s682_s8 + $0x88] sm:$0xff]  ;;  %v337_v16 = vld [vmem:[%s682_s8 + $0xb0] sm:$0xff] }
  0x2f   : > { %v314_v25 = vsub.f32 %v312_v17, %v313_v21  ;;  %v350_v26 = vmul.f32 %v690_v22, %v315_v18  ;;  %v351_v27 = vmul.f32 %v690_v22, %v316_v19  ;;  %v352_v28 = vmul.f32 %v690_v22, %v317_v20  ;;  %v338_v19 = vld [vmem:[%s682_s8 + $0xb8] sm:$0xff] }
  0x30   : > { %v353_v30 = vmul.f32 %v690_v22, %v318_v23  ;;  %v354_v33 = vmul.f32 %v690_v22, %v319_v24  ;;  %v355_v35 = vmul.f32 %v690_v22, %v320_v29  ;;  %v356_v40 = vmul.f32 %v690_v22, %v321_v31  ;;  %v339_v23 = vld [vmem:[%s682_s8 + $0xc0] sm:$0xff]  ;;  %v341_v29 = vld [vmem:[%s682_s8 + $0xd0] sm:$0xff] }
  0x31   : > { %v700_v32 = vperm.slane %v314_v25, 0  ;;  %v357_v43 = vmul.f32 %v690_v22, %v322_v34  ;;  %v358_v46 = vmul.f32 %v690_v22, %v323_v36  ;;  %v359_v49 = vmul.f32 %v690_v22, %v324_v41  ;;  %v343_v36 = vld [vmem:[%s682_s8 + $0xe0] sm:$0xff] }
  0x32   : > { %v360_v52 = vmul.f32 %v690_v22, %v325_v44  ;;  %v361_v55 = vmul.f32 %v690_v22, %v326_v47  ;;  %v362_v58 = vmul.f32 %v690_v22, %v327_v50  ;;  %v363_v61 = vmul.f32 %v690_v22, %v328_v53 }
  0x33   : > { %v385_v37 = vadd.f32 %v700_v32, %v350_v26  ;;  %v386_v38 = vadd.f32 %v700_v32, %v351_v27  ;;  %v387_v39 = vadd.f32 %v700_v32, %v352_v28  ;;  %v388_v42 = vadd.f32 %v700_v32, %v353_v30  ;;  %v340_v26 = vld [vmem:[%s682_s8 + $0xc8] sm:$0xff] }
  0x34   : > { %v389_v45 = vadd.f32 %v700_v32, %v354_v33  ;;  %v390_v48 = vadd.f32 %v700_v32, %v355_v35  ;;  %v391_v51 = vadd.f32 %v700_v32, %v356_v40  ;;  %v392_v54 = vadd.f32 %v700_v32, %v357_v43  ;;  %v342_v33 = vld [vmem:[%s682_s8 + $0xd8] sm:$0xff] }
  0x35   : > { %417 = vst [vmem:[%s707_s13] sm:$0xff] %v385_v37  ;;  %v393_v57 = vadd.f32 %v700_v32, %v358_v46  ;;  %v394_v60 = vadd.f32 %v700_v32, %v359_v49  ;;  %v395_v63 = vadd.f32 %v700_v32, %v360_v52  ;;  %v364_v0 = vmul.f32 %v690_v22, %v329_v56 }
  0x36   : > { %418 = vst [vmem:[%s707_s13 + $0x8] sm:$0xff] %v386_v38  ;;  %v396_v2 = vadd.f32 %v700_v32, %v361_v55  ;;  %v365_v3 = vmul.f32 %v690_v22, %v330_v59  ;;  %v397_v5 = vadd.f32 %v700_v32, %v362_v58  ;;  %v366_v6 = vmul.f32 %v690_v22, %v331_v62 }
  0x37   : > { %419 = vst [vmem:[%s707_s13 + $0x10] sm:$0xff] %v387_v39  ;;  %v398_v8 = vadd.f32 %v700_v32, %v363_v61  ;;  %v367_v9 = vmul.f32 %v690_v22, %v332_v1  ;;  %v399_v11 = vadd.f32 %v700_v32, %v364_v0  ;;  %v368_v12 = vmul.f32 %v690_v22, %v333_v4  ;;  %v344_v39 = vld [vmem:[%s682_s8 + $0xe8] sm:$0xff] }
  0x38   : > { %420 = vst [vmem:[%s707_s13 + $0x18] sm:$0xff] %v388_v42  ;;  %v400_v14 = vadd.f32 %v700_v32, %v365_v3  ;;  %v369_v15 = vmul.f32 %v690_v22, %v334_v7  ;;  %v401_v17 = vadd.f32 %v700_v32, %v366_v6  ;;  %v370_v18 = vmul.f32 %v690_v22, %v335_v10  ;;  %v345_v42 = vld [vmem:[%s682_s8 + $0xf0] sm:$0xff] }
  0x39   : > { %421 = vst [vmem:[%s707_s13 + $0x20] sm:$0xff] %v389_v45  ;;  %v402_v20 = vadd.f32 %v700_v32, %v367_v9  ;;  %v371_v21 = vmul.f32 %v690_v22, %v336_v13  ;;  %v403_v24 = vadd.f32 %v700_v32, %v368_v12  ;;  %v372_v25 = vmul.f32 %v690_v22, %v337_v16  ;;  %v346_v45 = vld [vmem:[%s682_s8 + $0xf8] sm:$0xff] }
  0x3a   : > { %422 = vst [vmem:[%s707_s13 + $0x28] sm:$0xff] %v390_v48  ;;  %v404_v27 = vadd.f32 %v700_v32, %v369_v15  ;;  %v373_v28 = vmul.f32 %v690_v22, %v338_v19  ;;  %v405_v30 = vadd.f32 %v700_v32, %v370_v18  ;;  %v374_v31 = vmul.f32 %v690_v22, %v339_v23 }
  0x3b   : > { %423 = vst [vmem:[%s707_s13 + $0x30] sm:$0xff] %v391_v51  ;;  %v406_v34 = vadd.f32 %v700_v32, %v371_v21  ;;  %v375_v35 = vmul.f32 %v690_v22, %v340_v26  ;;  %v407_v37 = vadd.f32 %v700_v32, %v372_v25  ;;  %v376_v38 = vmul.f32 %v690_v22, %v341_v29 }
  0x3c   : > { %424 = vst [vmem:[%s707_s13 + $0x38] sm:$0xff] %v392_v54  ;;  %v408_v40 = vadd.f32 %v700_v32, %v373_v28  ;;  %v377_v41 = vmul.f32 %v690_v22, %v342_v33  ;;  %v409_v43 = vadd.f32 %v700_v32, %v374_v31  ;;  %v378_v44 = vmul.f32 %v690_v22, %v343_v36 }
  0x3d   : > { %425 = vst [vmem:[%s707_s13 + $0x40] sm:$0xff] %v393_v57  ;;  %v410_v46 = vadd.f32 %v700_v32, %v375_v35  ;;  %v379_v47 = vmul.f32 %v690_v22, %v344_v39  ;;  %v411_v48 = vadd.f32 %v700_v32, %v376_v38  ;;  %v380_v49 = vmul.f32 %v690_v22, %v345_v42 }
  0x3e   : > { %426 = vst [vmem:[%s707_s13 + $0x48] sm:$0xff] %v394_v60  ;;  %v412_v50 = vadd.f32 %v700_v32, %v377_v41  ;;  %v381_v51 = vmul.f32 %v690_v22, %v346_v45  ;;  %v413_v52 = vadd.f32 %v700_v32, %v378_v44 }
  0x3f   : > { %427 = vst [vmem:[%s707_s13 + $0x50] sm:$0xff] %v395_v63  ;;  %v414_v53 = vadd.f32 %v700_v32, %v379_v47  ;;  %v415_v54 = vadd.f32 %v700_v32, %v380_v49 }
  0x40   : > { %428 = vst [vmem:[%s707_s13 + $0x58] sm:$0xff] %v396_v2  ;;  %v416_v55 = vadd.f32 %v700_v32, %v381_v51 }
  0x41   : > { %429 = vst [vmem:[%s707_s13 + $0x60] sm:$0xff] %v397_v5 }
  0x42   : > { %430 = vst [vmem:[%s707_s13 + $0x68] sm:$0xff] %v398_v8 }
  0x43   : > { %431 = vst [vmem:[%s707_s13 + $0x70] sm:$0xff] %v399_v11 }
  0x44   : > { %432 = vst [vmem:[%s707_s13 + $0x78] sm:$0xff] %v400_v14 }
  0x45   : > { %433 = vst [vmem:[%s707_s13 + $0x80] sm:$0xff] %v401_v17 }
  0x46   : > { %434 = vst [vmem:[%s707_s13 + $0x88] sm:$0xff] %v402_v20 }
  0x47   : > { %435 = vst [vmem:[%s707_s13 + $0x90] sm:$0xff] %v403_v24 }
  0x48   : > { %436 = vst [vmem:[%s707_s13 + $0x98] sm:$0xff] %v404_v27 }
  0x49   : > { %437 = vst [vmem:[%s707_s13 + $0xa0] sm:$0xff] %v405_v30 }
  0x4a   : > { %438 = vst [vmem:[%s707_s13 + $0xa8] sm:$0xff] %v406_v34 }
  0x4b   : > { %439 = vst [vmem:[%s707_s13 + $0xb0] sm:$0xff] %v407_v37 }
  0x4c   : > { %440 = vst [vmem:[%s707_s13 + $0xb8] sm:$0xff] %v408_v40 }
  0x4d   : > { %441 = vst [vmem:[%s707_s13 + $0xc0] sm:$0xff] %v409_v43 }
  0x4e   : > { %442 = vst [vmem:[%s707_s13 + $0xc8] sm:$0xff] %v410_v46 }
  0x4f   : > { %443 = vst [vmem:[%s707_s13 + $0xd0] sm:$0xff] %v411_v48 }
  0x50   : > { %444 = vst [vmem:[%s707_s13 + $0xd8] sm:$0xff] %v412_v50 }
  0x51   : > { %445 = vst [vmem:[%s707_s13 + $0xe0] sm:$0xff] %v413_v52 }
  0x52   : > { %446 = vst [vmem:[%s707_s13 + $0xe8] sm:$0xff] %v414_v53 }
  0x53   : > { %447 = vst [vmem:[%s707_s13 + $0xf0] sm:$0xff] %v415_v54 }
  0x54   : > { %448 = vst [vmem:[%s707_s13 + $0xf8] sm:$0xff] %v416_v55 }
  0x55 PF: > { %s15_s20 = sadd.s32 1, %s615_s20   ;;  %s839_s18 = smov %s611_s19 }
  0x56   : > { %p12_p5 = scmp.ge.s32.totalorder %s15_s20, 4   ;;  %s840_s19 = smov %s842_s21 }
  0x58   :  { %14 = sbr.rel (!%p12_p5) target bundleno = 2 (0x2), region = 76 }

// kernel: gated_block.2
= control target key start
LH: loop header
LB: loop body
LE: loop exit
PB: predicated region body
PF: predicated region fallthrough
CT: control target
= control target key end

     0   :  { %s1865_s18 = smov 0   ;;  %s1867_s19 = smov 0   ;;  %s2857_s0 = inlined_call_operand.vmem [shape: bf16[2,256,36], index: 0, kind: input, shape index: {}]   ;;  %s2858_s1 = inlined_call_operand.vmem [shape: bf16[36,128], index: 1, kind: input, shape index: {}]   ;;  %s2859_s2 = inlined_call_operand.vmem [shape: f32[1,128], index: 2, kind: input, shape index: {}]   ;;  %s2860_s3 = inlined_call_operand.vmem [shape: f32[2,256,128], index: 3, kind: output, shape index: {0}]   ;;  %s2861_s4 = inlined_call_operand.vmem [shape: f32[2,1,128], index: 4, kind: output, shape index: {1}]   ;;  %s2862_s5 = inlined_call_operand.vmem [shape: f32[2,1,128], index: 5, kind: output, shape index: {2}]  }
   0x1   :  { %s1869_s20 = smov 0  }
   0x2 LB: > { %s28_s21 = sadd.s32 1, %s1828_s19  ;;  %p1523_p0 = scmp.ge.s32.totalorder %s1832_s20, 1  ;;  %s1832_s20 = sphi %s1869_s20, %s16_s20   ;;  %s1828_s19 = sphi %s1867_s19, %s2948_s19   ;;  %s1824_s18 = sphi %s1865_s18, %s2947_s18  }
   0x3   : > { %p30_p1 = scmp.ge.s32.totalorder %s28_s21, 2  ;;  %p213_p2 = scmp.lt.s32.totalorder %s1832_s20, 3 }
   0x5   : > { %s2950_s21 = smov (%p30_p1, %s28_s21), 0  ;;  %p214_p3 = pnand %p1523_p0, %p213_p2 }
   0x6   : > { %p256_p4 = scmp.lt.s32.totalorder (!%p214_p3), %s1824_s18, 1 }
   0x7   : > { %217 = sbr.rel (%p214_p3) target bundleno = 387 (0x183), region = 32 }
   0xc   : > { %v318_v0 = vld [vmem:[%s2858_s1 + $0x10] sm:$0x3]  ;;  %vm467_vm0 = vcmask 1041408   ;;  %s2952_s18 = smov (!%p256_p4, %s1824_s18), 1  ;;  %v1637_v4 = vld [vmem:[%s2858_s1 + $0x8] sm:$0xff]  ;;  %v1636_v5 = vld [vmem:[%s2858_s1] sm:$0xff] }
   0xd   : > { %v412_v1 = vunpack.c.l.b16 %v318_v0  ;;  %s1618_s26 = sshll.u32 %s2952_s18, 7  ;;  %vm418_vm1 = vcmask 293888   ;;  %v1935_v22 = vld [vmem:[%s2859_s2] ss:$0 sm:$0xff]  ;;  %s1619_s9 = sshll.u32 %s2952_s18, 8 }
   0xe   : > { %s1898_s6 = scalar_lea.vmem %s2857_s0, %s1618_s26  ;;  %s2031_s12 = scalar_lea.vmem %s2860_s3, %s1619_s9 }
   0xf   : > { %v415_v2 = vpack.c.b16 %v412_v1, %v412_v1  ;;  %v1620_v6 = vld [vmem:[%s1898_s6] sm:$0xff]  ;;  %v1621_v10 = vld [vmem:[%s1898_s6 + $0x8] sm:$0xff]  ;;  %v1622_v14 = vld [vmem:[%s1898_s6 + $0x10] sm:$0xff]  ;;  %s2785_s17 = scalar_lea.vmem %s2861_s4, %s2952_s18  ;;  %s2794_s24 = scalar_lea.vmem %s2862_s5, %s2952_s18 }
  0x10   : > { %v1624_v7 = vld [vmem:[%s1898_s6 + $0x20] sm:$0xff]  ;;  %v1625_v11 = vld [vmem:[%s1898_s6 + $0x28] sm:$0xff]  ;;  %v1626_v15 = vld [vmem:[%s1898_s6 + $0x30] sm:$0xff] }
  0x11   : > { %v469_v3 = vsel %vm467_vm0, %v415_v2, 0  ;;  %v1628_v8 = vld [vmem:[%s1898_s6 + $0x40] sm:$0xff]  ;;  %v1629_v12 = vld [vmem:[%s1898_s6 + $0x48] sm:$0xff]  ;;  %v1630_v16 = vld [vmem:[%s1898_s6 + $0x50] sm:$0xff] }
  0x12   : > { %476 = vmatpush.bf16.msra.mxu0 %v469_v3  ;;  %1638 = vmatpush.bf16.msra.mxu1 %v469_v3  ;;  %v1632_v9 = vld [vmem:[%s1898_s6 + $0x60] sm:$0xff]  ;;  %v1633_v13 = vld [vmem:[%s1898_s6 + $0x68] sm:$0xff]  ;;  %v1634_v17 = vld [vmem:[%s1898_s6 + $0x70] sm:$0xff] }
  0x13   : > { %1639 = vmatpush.bf16.msra.mxu2 %v469_v3  ;;  %1640 = vmatpush.bf16.msra.mxu3 %v469_v3  ;;  %v1623_v18 = vld [vmem:[%s1898_s6 + $0x18] sm:$0xff] }
  0x14   : > { %v1627_v19 = vld [vmem:[%s1898_s6 + $0x38] sm:$0xff] }
  0x15   : > { %v1631_v20 = vld [vmem:[%s1898_s6 + $0x58] sm:$0xff] }
  0x16   : > { %477 = vmatpush.bf16.msra.mxu0 %v1637_v4  ;;  %1641 = vmatpush.bf16.msra.mxu1 %v1637_v4  ;;  %v1635_v21 = vld [vmem:[%s1898_s6 + $0x78] sm:$0xff] }
  0x17   : > { %1642 = vmatpush.bf16.msra.mxu2 %v1637_v4  ;;  %1643 = vmatpush.bf16.msra.mxu3 %v1637_v4 }
  0x1a   : > { %478 = vmatpush.bf16.msra.mxu0 %v1636_v5  ;;  %1644 = vmatpush.bf16.msra.mxu1 %v1636_v5 }
  0x1b   : > { %1645 = vmatpush.bf16.msra.mxu2 %v1636_v5  ;;  %1646 = vmatpush.bf16.msra.mxu3 %v1636_v5 }
  0x1d   : > { %1600 = vmatmul.msk.bf16.vlgmr.msra.gmra.mxu0 %vm418_vm1, %v1620_v6  ;;  %1604 = vmatmul.msk.bf16.vlgmr.msra.gmra.mxu1 %vm418_vm1, %v1624_v7 }
  0x1e   : > { %1608 = vmatmul.msk.bf16.vlgmr.msra.gmra.mxu2 %vm418_vm1, %v1628_v8  ;;  %1612 = vmatmul.msk.bf16.vlgmr.msra.gmra.mxu3 %vm418_vm1, %v1632_v9 }
  0x2d   : > { %1601 = vmatmul.msk.bf16.gmra.mxu0 %vm418_vm1, %v1621_v10  ;;  %1605 = vmatmul.msk.bf16.gmra.mxu1 %vm418_vm1, %v1625_v11 }
  0x2e   : > { %1609 = vmatmul.msk.bf16.gmra.mxu2 %vm418_vm1, %v1629_v12  ;;  %1613 = vmatmul.msk.bf16.gmra.mxu3 %vm418_vm1, %v1633_v13 }
  0x3d   : > { %1602 = vmatmul.msk.bf16.gmra.mxu0 %vm418_vm1, %v1622_v14  ;;  %1606 = vmatmul.msk.bf16.gmra.mxu1 %vm418_vm1, %v1626_v15 }
  0x3e   : > { %1610 = vmatmul.msk.bf16.gmra.mxu2 %vm418_vm1, %v1630_v16  ;;  %1614 = vmatmul.msk.bf16.gmra.mxu3 %vm418_vm1, %v1634_v17 }
  0x4d   : > { %1603 = vmatmul.msk.bf16.gmra.mxu0 %vm418_vm1, %v1623_v18  ;;  %1607 = vmatmul.msk.bf16.gmra.mxu1 %vm418_vm1, %v1627_v19 }
  0x4e   : > { %1611 = vmatmul.msk.bf16.gmra.mxu2 %vm418_vm1, %v1631_v20  ;;  %1615 = vmatmul.msk.bf16.gmra.mxu3 %vm418_vm1, %v1635_v21 }
  0x9a   : > { %v480_v23 = vpop.f32.mrf.mxu0  ;;  %v500_v24 = vpop.f32.mrf.mxu1 }
  0x9b   : > { %v1938_v25 = vadd.f32 %v1935_v22, %v480_v23  ;;  %v1941_v26 = vadd.f32 %v1935_v22, %v500_v24 }
  0x9d   : > { %v592_v27 = vsub.f32 0.0, %v1938_v25  ;;  %v600_v28 = vsub.f32 0.0, %v1941_v26  ;;  %v560_v56 = vmax.f32 %v1938_v25, 0.0  ;;  %v568_v57 = vmax.f32 %v1941_v26, 0.0 }
  0x9f   : > { %v624_v29 = vmul.f32 1.442695, %v592_v27  ;;  %v640_v30 = vmul.f32 1.442695, %v600_v28 }
  0xa1   : > { %1673 = vpow2.f32 %v624_v29  ;;  %v520_v31 = vpop.f32.mrf.mxu2  ;;  %v540_v32 = vpop.f32.mrf.mxu3 }
  0xa2   : > { %1675 = vpow2.f32 %v640_v30  ;;  %v1946_v33 = vadd.f32 %v1935_v22, %v520_v31  ;;  %v482_v34 = vpop.f32.mrf.mxu0  ;;  %v502_v35 = vpop.f32.mrf.mxu1  ;;  %v1949_v36 = vadd.f32 %v1935_v22, %v540_v32 }
  0xa3   : > { %v1952_v37 = vadd.f32 %v1935_v22, %v482_v34  ;;  %v1955_v38 = vadd.f32 %v1935_v22, %v502_v35 }
  0xa4   : > { %v608_v39 = vsub.f32 0.0, %v1946_v33  ;;  %v616_v42 = vsub.f32 0.0, %v1949_v36  ;;  %v576_v59 = vmax.f32 %v1946_v33, 0.0  ;;  %v584_v10 = vmax.f32 %v1949_v36, 0.0 }
  0xa5   : > { %v593_v40 = vsub.f32 0.0, %v1952_v37  ;;  %v601_v41 = vsub.f32 0.0, %v1955_v38  ;;  %v561_v62 = vmax.f32 %v1952_v37, 0.0  ;;  %v569_v63 = vmax.f32 %v1955_v38, 0.0 }
  0xa6   : > { %v656_v43 = vmul.f32 1.442695, %v608_v39  ;;  %v672_v50 = vmul.f32 1.442695, %v616_v42 }
  0xa7   : > { %v1674_v44 = vpop.eup %1673  ;;  %v626_v45 = vmul.f32 1.442695, %v593_v40  ;;  %v642_v48 = vmul.f32 1.442695, %v601_v41 }
  0xa8   : > { %v1676_v46 = vpop.eup %1675  ;;  %v1961_v47 = vadd.f32 1.0, %v1674_v44  ;;  %1677 = vpow2.f32 %v656_v43 }
  0xa9   : > { %v696_v49 = vadd.f32 1.0, %v1676_v46  ;;  %1679 = vpow2.f32 %v626_v45  ;;  %v522_v54 = vpop.f32.mrf.mxu2  ;;  %v542_v11 = vpop.f32.mrf.mxu3 }
  0xaa   : > { %1681 = vrcp.f32 %v1961_v47  ;;  %v731_v51 = vand.u32 2147483648, %v1961_v47  ;;  %v729_v52 = vand.u32 2147483647, %v1961_v47  ;;  %vm725_vm2 = vweird.f32 %v1961_v47  ;;  %v485_v0 = vpop.f32.mrf.mxu0  ;;  %v505_v1 = vpop.f32.mrf.mxu1 }
  0xab   : > { %1683 = vrcp.f32 %v696_v49  ;;  %v849_v53 = vand.u32 2147483647, %v696_v49  ;;  %v851_v58 = vand.u32 2147483648, %v696_v49  ;;  %vm845_vm3 = vweird.f32 %v696_v49 }
  0xac   : > { %1685 = vpow2.f32 %v642_v48  ;;  %v732_v3 = vor.u32 1.1754944e-38, %v731_v51  ;;  %v1977_v5 = vadd.f32 %v1935_v22, %v522_v54  ;;  %vm1980_vm4 = vcmp.eq.f32.partialorder %v729_v52, 8.507059e+37 }
  0xad   : > { %1687 = vpow2.f32 %v672_v50  ;;  %vm1984_vm5 = vcmp.eq.f32.partialorder %v849_v53, 8.507059e+37  ;;  %v852_v14 = vor.u32 1.1754944e-38, %v851_v58  ;;  %v1991_v15 = vadd.f32 %v1935_v22, %v485_v0 }
  0xae   : > { %v1678_v55 = vpop.eup %1677  ;;  %v1994_v16 = vadd.f32 %v1935_v22, %v505_v1  ;;  %v609_v23 = vsub.f32 0.0, %v1977_v5  ;;  %v2001_v24 = vadd.f32 %v1935_v22, %v542_v11 }
  0xaf   : > { %v1680_v60 = vpop.eup %1679  ;;  %v1970_v61 = vadd.f32 1.0, %v1678_v55  ;;  %v594_v32 = vsub.f32 0.0, %v1991_v15 }
  0xb0   : > { %v1682_v2 = vpop.eup %1681  ;;  %v1974_v4 = vadd.f32 1.0, %v1680_v60  ;;  %v658_v45 = vmul.f32 1.442695, %v609_v23  ;;  %v602_v26 = vsub.f32 0.0, %v1994_v16  ;;  %v570_v36 = vmax.f32 %v1994_v16, 0.0 }
  0xb1   : > { %v1684_v6 = vpop.eup %1683  ;;  %v721_v7 = vmul.f32 %v1682_v2, %v1961_v47  ;;  %1689 = vrcp.f32 %v1970_v61  ;;  %v969_v19 = vand.u32 2147483647, %v1970_v61  ;;  %v971_v20 = vand.u32 2147483648, %v1970_v61  ;;  %v545_v8 = vpop.f32.mrf.mxu3 }
  0xb2   : > { %v1686_v12 = vpop.eup %1685  ;;  %v841_v13 = vmul.f32 %v1684_v6, %v696_v49  ;;  %1691 = vrcp.f32 %v1974_v4  ;;  %vm846_vm6 = vweird.f32 %v1684_v6  ;;  %vm726_vm7 = vweird.f32 %v1682_v2  ;;  %v487_v38 = vpop.f32.mrf.mxu0 }
  0xb3   : > { %v1688_v17 = vpop.eup %1687  ;;  %v722_v18 = vsub.f32 1.0, %v721_v7  ;;  %v2003_v28 = vadd.f32 1.0, %v1686_v12  ;;  %vm965_vm8 = vweird.f32 %v1970_v61  ;;  %v744_v31 = vand.u32 2147483647, %v1974_v4  ;;  %vm2012_vm9 = vmor %vm845_vm3, %vm846_vm6 }
  0xb4   : > { %v842_v21 = vsub.f32 1.0, %v841_v13  ;;  %v2005_v29 = vadd.f32 1.0, %v1688_v17  ;;  %vm2016_vm10 = vcmp.eq.f32.partialorder %v969_v19, 8.507059e+37  ;;  %v972_v41 = vor.u32 1.1754944e-38, %v971_v20  ;;  %vm727_vm11 = vmor %vm725_vm2, %vm726_vm7 }
  0xb5   : > { %v723_v27 = vmul.f32 %v1682_v2, %v722_v18  ;;  %1693 = vrcp.f32 %v2003_v28  ;;  %vm740_vm12 = vweird.f32 %v1974_v4  ;;  %v746_v44 = vand.u32 2147483648, %v1974_v4 }
  0xb6   : > { %v843_v30 = vmul.f32 %v1684_v6, %v842_v21  ;;  %v864_v49 = vand.u32 2147483647, %v2003_v28  ;;  %1695 = vrcp.f32 %v2005_v29  ;;  %vm2038_vm14 = vcmp.eq.f32.partialorder %v744_v31, 8.507059e+37  ;;  %v525_v31 = vpop.f32.mrf.mxu2 }
  0xb7   : > { %v1690_v34 = vpop.eup %1689  ;;  %v724_v35 = vadd.f32 %v1682_v2, %v723_v27  ;;  %v866_v58 = vand.u32 2147483648, %v2003_v28  ;;  %v628_v60 = vmul.f32 1.442695, %v594_v32  ;;  %vm860_vm0 = vweird.f32 %v2003_v28 }
  0xb8   : > { %v844_v42 = vadd.f32 %v1684_v6, %v843_v30  ;;  %v961_v43 = vmul.f32 %v1690_v34, %v1970_v61  ;;  %v1692_v46 = vpop.eup %1691  ;;  %vm966_vm13 = vweird.f32 %v1690_v34  ;;  %vm1085_vm1 = vweird.f32 %v2005_v29 }
  0xb9   : > { %v728_v48 = vsel %vm727_vm11, %v1682_v2, %v724_v35  ;;  %v736_v52 = vmul.f32 %v1692_v46, %v1974_v4  ;;  %vm2053_vm15 = vmor %vm965_vm8, %vm966_vm13  ;;  %1697 = vpow2.f32 %v658_v45  ;;  %vm741_vm2 = vweird.f32 %v1692_v46 }
  0xba   : > { %v733_v47 = vsel %vm1980_vm4, %v732_v3, %v728_v48  ;;  %v848_v50 = vsel %vm2012_vm9, %v1684_v6, %v844_v42  ;;  %v962_v51 = vsub.f32 1.0, %v961_v43  ;;  %v747_v3 = vor.u32 1.1754944e-38, %v746_v44  ;;  %vm742_vm4 = vmor %vm740_vm12, %vm741_vm2 }
  0xbb   : > { %v1200_v54 = vmul.f32 %v733_v47, %v560_v56  ;;  %v853_v55 = vsel %vm1984_vm5, %v852_v14, %v848_v50  ;;  %v737_v2 = vsub.f32 1.0, %v736_v52  ;;  %v1694_v6 = vpop.eup %1693  ;;  %vm2062_vm3 = vcmp.eq.f32.partialorder %v864_v49, 8.507059e+37 }
  0xbc   : > { %v1208_v0 = vmul.f32 %v853_v55, %v568_v57  ;;  %v963_v1 = vmul.f32 %v1690_v34, %v962_v51  ;;  %v856_v7 = vmul.f32 %v1694_v6, %v2003_v28  ;;  %v1696_v61 = vpop.eup %1695  ;;  %v867_v9 = vor.u32 1.1754944e-38, %v866_v58 }
  0xbd   : > { %1232 = vst [vmem:[%s2031_s12] sm:$0xff] %v1200_v54  ;;  %v738_v57 = vmul.f32 %v1692_v46, %v737_v2  ;;  %v1089_v11 = vand.u32 2147483647, %v2005_v29  ;;  %v1091_v12 = vand.u32 2147483648, %v2005_v29  ;;  %1699 = vpow2.f32 %v628_v60 }
  0xbe   : > { %1240 = vst [vmem:[%s2031_s12 + $0x40] sm:$0xff] %v1208_v0  ;;  %v964_v56 = vadd.f32 %v1690_v34, %v963_v1  ;;  %v857_v17 = vsub.f32 1.0, %v856_v7  ;;  %v1081_v18 = vmul.f32 %v1696_v61, %v2005_v29  ;;  %vm861_vm5 = vweird.f32 %v1694_v6  ;;  %v507_v1 = vpop.f32.mrf.mxu1 }
  0xbf   : > { %v739_v14 = vadd.f32 %v1692_v46, %v738_v57  ;;  %vm1086_vm6 = vweird.f32 %v1696_v61  ;;  %v644_v20 = vmul.f32 1.442695, %v602_v26  ;;  %v1698_v32 = vpop.eup %1697  ;;  %v617_v4 = vsub.f32 0.0, %v2001_v24  ;;  %vm862_vm7 = vmor %vm860_vm0, %vm861_vm5 }
  0xc0   : > { %v968_v13 = vsel %vm2053_vm15, %v1690_v34, %v964_v56  ;;  %v858_v27 = vmul.f32 %v1694_v6, %v857_v17  ;;  %v1082_v30 = vsub.f32 1.0, %v1081_v18  ;;  %v1311_v34 = vmul.f32 %v1200_v54, %v1200_v54  ;;  %vm2093_vm9 = vmor %vm1085_vm1, %vm1086_vm6 }
  0xc1   : > { %v973_v19 = vsel %vm2016_vm10, %v972_v41, %v968_v13  ;;  %v743_v23 = vsel %vm742_vm4, %v1692_v46, %v739_v14  ;;  %1701 = vpow2.f32 %v644_v20  ;;  %vm2086_vm8 = vcmp.eq.f32.partialorder %v1089_v11, 8.507059e+37 }
  0xc2   : > { %v1216_v21 = vmul.f32 %v973_v19, %v576_v59  ;;  %v748_v35 = vsel %vm2038_vm14, %v747_v3, %v743_v23  ;;  %v859_v40 = vadd.f32 %v1694_v6, %v858_v27  ;;  %v1083_v33 = vmul.f32 %v1696_v61, %v1082_v30 }
  0xc3   : > { %v1201_v39 = vmul.f32 %v748_v35, %v561_v62  ;;  %v1700_v41 = vpop.eup %1699  ;;  %v1092_v37 = vor.u32 1.1754944e-38, %v1091_v12  ;;  %v705_v62 = vadd.f32 1.0, %v1698_v32  ;;  %v674_v43 = vmul.f32 1.442695, %v617_v4 }
  0xc4   : > { %1248 = vst [vmem:[%s2031_s12 + $0x80] sm:$0xff] %v1216_v21  ;;  %v2098_v44 = vadd.f32 %v1935_v22, %v525_v31  ;;  %v863_v46 = vsel %vm862_vm7, %v1694_v6, %v859_v40  ;;  %v1084_v48 = vadd.f32 %v1696_v61, %v1083_v33  ;;  %v2113_v53 = vadd.f32 1.0, %v1700_v41 }
  0xc5   : > { %1233 = vst [vmem:[%s2031_s12 + $0x8] sm:$0xff] %v1201_v39  ;;  %v2101_v28 = vadd.f32 %v1201_v39, %v1200_v54  ;;  %v1312_v45 = vmul.f32 %v1201_v39, %v1201_v39  ;;  %v868_v29 = vsel %vm2062_vm3, %v867_v9, %v863_v46  ;;  %1703 = vrcp.f32 %v705_v62 }
  0xc6   : > { %v1209_v47 = vmul.f32 %v868_v29, %v569_v63  ;;  %v1088_v50 = vsel %vm2093_vm9, %v1696_v61, %v1084_v48  ;;  %1705 = vpow2.f32 %v674_v43  ;;  %v610_v54 = vsub.f32 0.0, %v2098_v44  ;;  %v527_v48 = vpop.f32.mrf.mxu2 }
  0xc7   : > { %v2105_v49 = vadd.f32 %v1312_v45, %v1311_v34  ;;  %v1702_v51 = vpop.eup %1701  ;;  %v1093_v52 = vsel %vm2086_vm8, %v1092_v37, %v1088_v50  ;;  %v984_v58 = vand.u32 2147483647, %v705_v62  ;;  %1707 = vrcp.f32 %v2113_v53 }
  0xc8   : > { %1241 = vst [vmem:[%s2031_s12 + $0x48] sm:$0xff] %v1209_v47  ;;  %v1224_v55 = vmul.f32 %v1093_v52, %v584_v10  ;;  %v2119_v60 = vadd.f32 1.0, %v1702_v51  ;;  %v577_v63 = vmax.f32 %v1977_v5, 0.0  ;;  %v562_v0 = vmax.f32 %v1991_v15, 0.0 }
  0xc9   : > { %vm980_vm10 = vweird.f32 %v705_v62  ;;  %v986_v3 = vand.u32 2147483648, %v705_v62  ;;  %v660_v10 = vmul.f32 1.442695, %v610_v54  ;;  %vm2127_vm11 = vcmp.eq.f32.partialorder %v984_v58, 8.507059e+37 }
  0xca   : > { %1256 = vst [vmem:[%s2031_s12 + $0xc0] sm:$0xff] %v1224_v55  ;;  %1709 = vrcp.f32 %v2119_v60  ;;  %v759_v26 = vand.u32 2147483647, %v2113_v53  ;;  %v2133_v5 = vadd.f32 %v1935_v22, %v487_v38  ;;  %v761_v57 = vand.u32 2147483648, %v2113_v53 }
  0xcb   : > { %v1704_v2 = vpop.eup %1703  ;;  %1711 = vpow2.f32 %v660_v10  ;;  %v2137_v7 = vadd.f32 %v1935_v22, %v507_v1  ;;  %v2143_v12 = vadd.f32 %v1935_v22, %v545_v8  ;;  %v987_v14 = vor.u32 1.1754944e-38, %v986_v3 }
  0xcc   : > { %v976_v6 = vmul.f32 %v1704_v2, %v705_v62  ;;  %v1706_v56 = vpop.eup %1705  ;;  %vm981_vm12 = vweird.f32 %v1704_v2  ;;  %v595_v11 = vsub.f32 0.0, %v2133_v5  ;;  %vm755_vm13 = vweird.f32 %v2113_v53 }
  0xcd   : > { %v2139_v9 = vadd.f32 1.0, %v1706_v56  ;;  %v1708_v13 = vpop.eup %1707  ;;  %vm875_vm14 = vweird.f32 %v2119_v60  ;;  %v879_v17 = vand.u32 2147483647, %v2119_v60  ;;  %v603_v21 = vsub.f32 0.0, %v2137_v7  ;;  %vm2153_vm15 = vmor %vm980_vm10, %vm981_vm12 }
  0xce   : > { %v977_v61 = vsub.f32 1.0, %v976_v6  ;;  %v751_v20 = vmul.f32 %v1708_v13, %v2113_v53  ;;  %vm2157_vm0 = vcmp.eq.f32.partialorder %v759_v26, 8.507059e+37  ;;  %v762_v30 = vor.u32 1.1754944e-38, %v761_v57 }
  0xcf   : > { %1713 = vrcp.f32 %v2139_v9  ;;  %v881_v32 = vand.u32 2147483648, %v2119_v60  ;;  %v630_v4 = vmul.f32 1.442695, %v595_v11  ;;  %v618_v39 = vsub.f32 0.0, %v2143_v12 }
  0xd0   : > { %v1710_v18 = vpop.eup %1709  ;;  %v978_v19 = vmul.f32 %v1704_v2, %v977_v61  ;;  %v752_v35 = vsub.f32 1.0, %v751_v20  ;;  %vm756_vm1 = vweird.f32 %v1708_v13  ;;  %vm2164_vm3 = vcmp.eq.f32.partialorder %v879_v17, 8.507059e+37  ;;  %v490_v61 = vpop.f32.mrf.mxu0 }
  0xd1   : > { %v871_v31 = vmul.f32 %v1710_v18, %v2119_v60  ;;  %v1712_v40 = vpop.eup %1711  ;;  %vm876_vm2 = vweird.f32 %v1710_v18  ;;  %v646_v62 = vmul.f32 1.442695, %v603_v21  ;;  %v882_v46 = vor.u32 1.1754944e-38, %v881_v32  ;;  %vm757_vm5 = vmor %vm755_vm13, %vm756_vm1 }
  0xd2   : > { %v979_v34 = vadd.f32 %v1704_v2, %v978_v19  ;;  %v753_v42 = vmul.f32 %v1708_v13, %v752_v35  ;;  %v2170_v37 = vadd.f32 1.0, %v1712_v40  ;;  %1715 = vpow2.f32 %v630_v4  ;;  %vm2176_vm4 = vmor %vm875_vm14, %vm876_vm2 }
  0xd3   : > { %v872_v33 = vsub.f32 1.0, %v871_v31  ;;  %v676_v52 = vmul.f32 1.442695, %v618_v39  ;;  %v1104_v58 = vand.u32 2147483647, %v2139_v9  ;;  %v1106_v38 = vand.u32 2147483648, %v2139_v9 }
  0xd4   : > { %v983_v41 = vsel %vm2153_vm15, %v1704_v2, %v979_v34  ;;  %v754_v50 = vadd.f32 %v1708_v13, %v753_v42  ;;  %1717 = vrcp.f32 %v2170_v37  ;;  %vm1100_vm6 = vweird.f32 %v2139_v9  ;;  %v510_v42 = vpop.f32.mrf.mxu1 }
  0xd5   : > { %v988_v43 = vsel %vm2127_vm11, %v987_v14, %v983_v41  ;;  %v873_v45 = vmul.f32 %v1710_v18, %v872_v33  ;;  %v1714_v29 = vpop.eup %1713  ;;  %1719 = vpow2.f32 %v646_v62  ;;  %v585_v6 = vmax.f32 %v2001_v24, 0.0 }
  0xd6   : > { %v1217_v47 = vmul.f32 %v988_v43, %v577_v63  ;;  %v1096_v55 = vmul.f32 %v1714_v29, %v2139_v9  ;;  %v758_v60 = vsel %vm757_vm5, %v1708_v13, %v754_v50  ;;  %v2190_v63 = vadd.f32 %v1935_v22, %v527_v48 }
  0xd7   : > { %v874_v54 = vadd.f32 %v1710_v18, %v873_v45  ;;  %v763_v53 = vsel %vm2157_vm0, %v762_v30, %v758_v60  ;;  %vm1101_vm7 = vweird.f32 %v1714_v29  ;;  %1721 = vpow2.f32 %v676_v52 }
  0xd8   : > { %1249 = vst [vmem:[%s2031_s12 + $0x88] sm:$0xff] %v1217_v47  ;;  %v1097_v2 = vsub.f32 1.0, %v1096_v55  ;;  %v1202_v3 = vmul.f32 %v763_v53, %v562_v0  ;;  %v1716_v25 = vpop.eup %1715  ;;  %vm2203_vm8 = vcmp.eq.f32.partialorder %v1104_v58, 8.507059e+37  ;;  %v1107_v8 = vor.u32 1.1754944e-38, %v1106_v38  ;;  %vm2214_vm9 = vmor %vm1100_vm6, %vm1101_vm7 }
  0xd9   : > { %v878_v1 = vsel %vm2176_vm4, %v1710_v18, %v874_v54  ;;  %v2218_v16 = vadd.f32 1.0, %v1716_v25  ;;  %vm995_vm10 = vweird.f32 %v2170_v37  ;;  %v1001_v9 = vand.u32 2147483648, %v2170_v37 }
  0xda   : > { %v883_v10 = vsel %vm2164_vm3, %v882_v46, %v878_v1  ;;  %v1098_v56 = vmul.f32 %v1714_v29, %v1097_v2  ;;  %v1718_v15 = vpop.eup %1717  ;;  %1234 = vst [vmem:[%s2031_s12 + $0x10] sm:$0xff] %v1202_v3  ;;  %v2209_v0 = vadd.f32 %v2101_v28, %v1202_v3  ;;  %v1313_v11 = vmul.f32 %v1202_v3, %v1202_v3  ;;  %v547_v46 = vpop.f32.mrf.mxu3 }
  0xdb   : > { %v1210_v26 = vmul.f32 %v883_v10, %v570_v36  ;;  %v611_v36 = vsub.f32 0.0, %v2190_v63  ;;  %v991_v14 = vmul.f32 %v1718_v15, %v2170_v37  ;;  %v999_v28 = vand.u32 2147483647, %v2170_v37  ;;  %v1720_v17 = vpop.eup %1719 }
  0xdc   : > { %v1099_v13 = vadd.f32 %v1714_v29, %v1098_v56  ;;  %v2226_v18 = vadd.f32 %v2105_v49, %v1313_v11  ;;  %1723 = vrcp.f32 %v2218_v16  ;;  %v2231_v19 = vadd.f32 %v1935_v22, %v490_v61 }
  0xdd   : > { %1242 = vst [vmem:[%s2031_s12 + $0x50] sm:$0xff] %v1210_v26  ;;  %v992_v21 = vsub.f32 1.0, %v991_v14  ;;  %vm996_vm11 = vweird.f32 %v1718_v15  ;;  %v2235_v23 = vadd.f32 1.0, %v1720_v17  ;;  %v1722_v27 = vpop.eup %1721  ;;  %v662_v30 = vmul.f32 1.442695, %v611_v36 }
  0xde   : > { %v1103_v20 = vsel %vm2214_vm9, %v1714_v29, %v1099_v13  ;;  %vm2242_vm12 = vmor %vm995_vm10, %vm996_vm11  ;;  %vm2246_vm13 = vcmp.eq.f32.partialorder %v999_v28, 8.507059e+37  ;;  %v1002_v4 = vor.u32 1.1754944e-38, %v1001_v9  ;;  %v774_v39 = vand.u32 2147483647, %v2218_v16 }
  0xdf   : > { %v1108_v49 = vsel %vm2203_vm8, %v1107_v8, %v1103_v20  ;;  %v993_v32 = vmul.f32 %v1718_v15, %v992_v21  ;;  %1725 = vrcp.f32 %v2235_v23  ;;  %v2251_v40 = vadd.f32 1.0, %v1722_v27 }
  0xe0   : > { %v1225_v31 = vmul.f32 %v1108_v49, %v585_v6  ;;  %v776_v59 = vand.u32 2147483648, %v2218_v16  ;;  %1727 = vpow2.f32 %v662_v30  ;;  %v596_v41 = vsub.f32 0.0, %v2231_v19  ;;  %v530_v30 = vpop.f32.mrf.mxu2 }
  0xe1   : > { %v994_v33 = vadd.f32 %v1718_v15, %v993_v32  ;;  %v578_v62 = vmax.f32 %v2098_v44, 0.0  ;;  %v563_v43 = vmax.f32 %v2133_v5, 0.0  ;;  %v571_v45 = vmax.f32 %v2137_v7, 0.0 }
  0xe2   : > { %1257 = vst [vmem:[%s2031_s12 + $0xc8] sm:$0xff] %v1225_v31  ;;  %v1724_v37 = vpop.eup %1723  ;;  %1729 = vrcp.f32 %v2251_v40  ;;  %vm770_vm14 = vweird.f32 %v2218_v16  ;;  %v586_v47 = vmax.f32 %v2143_v12, 0.0  ;;  %vm2267_vm15 = vcmp.eq.f32.partialorder %v774_v39, 8.507059e+37  ;;  %v492_v31 = vpop.f32.mrf.mxu0 }
  0xe3   : > { %v998_v48 = vsel %vm2242_vm12, %v1718_v15, %v994_v33  ;;  %v766_v29 = vmul.f32 %v1724_v37, %v2218_v16  ;;  %v632_v50 = vmul.f32 1.442695, %v596_v41  ;;  %v2272_v51 = vadd.f32 %v1935_v22, %v510_v42 }
  0xe4   : > { %v1003_v44 = vsel %vm2246_vm13, %v1002_v4, %v998_v48  ;;  %v777_v58 = vor.u32 1.1754944e-38, %v776_v59  ;;  %v2275_v38 = vadd.f32 %v1935_v22, %v547_v46  ;;  %vm890_vm0 = vweird.f32 %v2235_v23 }
  0xe5   : > { %v1726_v52 = vpop.eup %1725  ;;  %v1218_v54 = vmul.f32 %v1003_v44, %v578_v62  ;;  %v767_v55 = vsub.f32 1.0, %v766_v29  ;;  %v894_v53 = vand.u32 2147483647, %v2235_v23  ;;  %1731 = vpow2.f32 %v632_v50 }
  0xe6   : > { %v886_v60 = vmul.f32 %v1726_v52, %v2235_v23  ;;  %v1728_v1 = vpop.eup %1727  ;;  %vm771_vm1 = vweird.f32 %v1724_v37  ;;  %v896_v3 = vand.u32 2147483648, %v2235_v23  ;;  %v604_v10 = vsub.f32 0.0, %v2272_v51 }
  0xe7   : > { %1250 = vst [vmem:[%s2031_s12 + $0x90] sm:$0xff] %v1218_v54  ;;  %v768_v2 = vmul.f32 %v1724_v37, %v767_v55  ;;  %vm1115_vm2 = vweird.f32 %v2251_v40  ;;  %v2284_v26 = vadd.f32 1.0, %v1728_v1  ;;  %v619_v56 = vsub.f32 0.0, %v2275_v38  ;;  %vm772_vm3 = vmor %vm770_vm14, %vm771_vm1 }
  0xe8   : > { %v1730_v6 = vpop.eup %1729  ;;  %v887_v25 = vsub.f32 1.0, %v886_v60  ;;  %v1119_v61 = vand.u32 2147483647, %v2251_v40  ;;  %v648_v15 = vmul.f32 1.442695, %v604_v10  ;;  %vm891_vm4 = vweird.f32 %v1726_v52 }
  0xe9   : > { %v769_v57 = vadd.f32 %v1724_v37, %v768_v2  ;;  %v1111_v8 = vmul.f32 %v1730_v6, %v2251_v40  ;;  %v1121_v24 = vand.u32 2147483648, %v2251_v40  ;;  %1733 = vrcp.f32 %v2284_v26  ;;  %vm892_vm7 = vmor %vm890_vm0, %vm891_vm4 }
  0xea   : > { %v888_v11 = vmul.f32 %v1726_v52, %v887_v25  ;;  %vm1116_vm5 = vweird.f32 %v1730_v6  ;;  %1735 = vpow2.f32 %v648_v15  ;;  %vm2295_vm6 = vcmp.eq.f32.partialorder %v894_v53, 8.507059e+37  ;;  %v512_v25 = vpop.f32.mrf.mxu1 }
  0xeb   : > { %v773_v36 = vsel %vm772_vm3, %v1724_v37, %v769_v57  ;;  %v1112_v13 = vsub.f32 1.0, %v1111_v8  ;;  %v1732_v14 = vpop.eup %1731  ;;  %v678_v16 = vmul.f32 1.442695, %v619_v56  ;;  %v897_v21 = vor.u32 1.1754944e-38, %v896_v3  ;;  %vm2306_vm8 = vmor %vm1115_vm2, %vm1116_vm5 }
  0xec   : > { %v778_v28 = vsel %vm2267_vm15, %v777_v58, %v773_v36  ;;  %v889_v17 = vadd.f32 %v1726_v52, %v888_v11  ;;  %v2301_v49 = vadd.f32 1.0, %v1732_v14  ;;  %vm2310_vm9 = vcmp.eq.f32.partialorder %v1119_v61, 8.507059e+37 }
  0xed   : > { %v1203_v20 = vmul.f32 %v778_v28, %v563_v43  ;;  %v1113_v27 = vmul.f32 %v1730_v6, %v1112_v13  ;;  %v1122_v23 = vor.u32 1.1754944e-38, %v1121_v24  ;;  %1737 = vpow2.f32 %v678_v16  ;;  %v532_v28 = vpop.f32.mrf.mxu2 }
  0xee   : > { %v893_v32 = vsel %vm892_vm7, %v1726_v52, %v889_v17  ;;  %1739 = vrcp.f32 %v2301_v49  ;;  %v2326_v42 = vadd.f32 %v1935_v22, %v530_v30  ;;  %v2329_v37 = vadd.f32 %v1935_v22, %v492_v31 }
  0xef   : > { %1235 = vst [vmem:[%s2031_s12 + $0x18] sm:$0xff] %v1203_v20  ;;  %v2316_v4 = vadd.f32 %v2209_v0, %v1203_v20  ;;  %v1314_v39 = vmul.f32 %v1203_v20, %v1203_v20  ;;  %v898_v33 = vsel %vm2295_vm6, %v897_v21, %v893_v32  ;;  %v1114_v40 = vadd.f32 %v1730_v6, %v1113_v27  ;;  %v1734_v59 = vpop.eup %1733 }
  0xf0   : > { %v2322_v41 = vmul.f32 %v898_v33, %v571_v45  ;;  %v1736_v0 = vpop.eup %1735  ;;  %v1006_v7 = vmul.f32 %v1734_v59, %v2284_v26  ;;  %vm1010_vm10 = vweird.f32 %v2284_v26  ;;  %v1014_v46 = vand.u32 2147483647, %v2284_v26 }
  0xf1   : > { %v2332_v62 = vadd.f32 %v2226_v18, %v1314_v39  ;;  %v1118_v43 = vsel %vm2306_vm8, %v1730_v6, %v1114_v40  ;;  %v1016_v48 = vand.u32 2147483648, %v2284_v26  ;;  %vm1011_vm11 = vweird.f32 %v1734_v59 }
  0xf2   : > { %1243 = vst [vmem:[%s2031_s12 + $0x58] sm:$0xff] %v2322_v41  ;;  %v1123_v45 = vsel %vm2310_vm9, %v1122_v23, %v1118_v43  ;;  %v1007_v29 = vsub.f32 1.0, %v1006_v7  ;;  %v2348_v44 = vadd.f32 1.0, %v1736_v0  ;;  %v612_v50 = vsub.f32 0.0, %v2326_v42  ;;  %vm2360_vm12 = vmor %vm1010_vm10, %vm1011_vm11 }
  0xf3   : > { %v2346_v18 = vmul.f32 %v1123_v45, %v586_v47  ;;  %v1738_v5 = vpop.eup %1737  ;;  %v597_v52 = vsub.f32 0.0, %v2329_v37  ;;  %v789_v55 = vand.u32 2147483647, %v2301_v49  ;;  %v791_v58 = vand.u32 2147483648, %v2301_v49 }
  0xf4   : > { %v1008_v54 = vmul.f32 %v1734_v59, %v1007_v29  ;;  %1741 = vrcp.f32 %v2348_v44  ;;  %v1740_v12 = vpop.eup %1739  ;;  %v579_v47 = vmax.f32 %v2190_v63, 0.0  ;;  %v1017_v53 = vor.u32 1.1754944e-38, %v1016_v48 }
  0xf5   : > { %1258 = vst [vmem:[%s2031_s12 + $0xd0] sm:$0xff] %v2346_v18  ;;  %v2364_v1 = vadd.f32 1.0, %v1738_v5  ;;  %v664_v2 = vmul.f32 1.442695, %v612_v50  ;;  %vm1015_vm13 = vcmp.eq.f32.partialorder %v1014_v46, 8.507059e+37  ;;  %v564_v10 = vmax.f32 %v2231_v19, 0.0  ;;  %v550_v19 = vpop.f32.mrf.mxu3 }
  0xf6   : > { %v1009_v3 = vadd.f32 %v1734_v59, %v1008_v54  ;;  %v781_v6 = vmul.f32 %v1740_v12, %v2301_v49  ;;  %vm785_vm14 = vweird.f32 %v2301_v49  ;;  %v911_v63 = vand.u32 2147483648, %v2348_v44 }
  0xf7   : > { %1743 = vrcp.f32 %v2364_v1  ;;  %v634_v26 = vmul.f32 1.442695, %v597_v52  ;;  %vm2373_vm15 = vcmp.eq.f32.partialorder %v789_v55, 8.507059e+37  ;;  %v792_v61 = vor.u32 1.1754944e-38, %v791_v58 }
  0xf8   : > { %v1013_v56 = vsel %vm2360_vm12, %v1734_v59, %v1009_v3  ;;  %v782_v57 = vsub.f32 1.0, %v781_v6  ;;  %1745 = vpow2.f32 %v664_v2  ;;  %v2378_v11 = vadd.f32 %v1935_v22, %v512_v25 }
  0xf9   : > { %v1018_v15 = vsel %vm1015_vm13, %v1017_v53, %v1013_v56  ;;  %v2381_v24 = vadd.f32 %v1935_v22, %v550_v19  ;;  %vm786_vm0 = vweird.f32 %v1740_v12  ;;  %vm905_vm1 = vweird.f32 %v2348_v44 }
  0xfa   : > { %v1742_v36 = vpop.eup %1741  ;;  %v2383_v13 = vmul.f32 %v1018_v15, %v579_v47  ;;  %v783_v14 = vmul.f32 %v1740_v12, %v782_v57  ;;  %v909_v9 = vand.u32 2147483647, %v2348_v44  ;;  %v912_v16 = vor.u32 1.1754944e-38, %v911_v63  ;;  %vm787_vm3 = vmor %vm785_vm14, %vm786_vm0 }
  0xfb   : > { %v901_v17 = vmul.f32 %v1742_v36, %v2348_v44  ;;  %1747 = vpow2.f32 %v634_v26  ;;  %vm1130_vm2 = vweird.f32 %v2364_v1  ;;  %v1134_v21 = vand.u32 2147483647, %v2364_v1 }
  0xfc   : > { %1251 = vst [vmem:[%s2031_s12 + $0x98] sm:$0xff] %v2383_v13  ;;  %v784_v20 = vadd.f32 %v1740_v12, %v783_v14  ;;  %v605_v27 = vsub.f32 0.0, %v2378_v11  ;;  %vm906_vm4 = vweird.f32 %v1742_v36  ;;  %v620_v32 = vsub.f32 0.0, %v2381_v24 }
  0xfd   : > { %v1744_v30 = vpop.eup %1743  ;;  %v902_v31 = vsub.f32 1.0, %v901_v17  ;;  %v2397_v34 = vadd.f32 %v1935_v22, %v532_v28  ;;  %v1136_v39 = vand.u32 2147483648, %v2364_v1  ;;  %vm2407_vm6 = vmor %vm905_vm1, %vm906_vm4  ;;  %vm910_vm7 = vcmp.eq.f32.partialorder %v909_v9, 8.507059e+37 }
  0xfe   : > { %v788_v35 = vsel %vm787_vm3, %v1740_v12, %v784_v20  ;;  %v1126_v23 = vmul.f32 %v1744_v30, %v2364_v1  ;;  %v650_v33 = vmul.f32 1.442695, %v605_v27  ;;  %v1746_v40 = vpop.eup %1745  ;;  %vm1131_vm5 = vweird.f32 %v1744_v30 }
  0xff   : > { %v793_v59 = vsel %vm2373_vm15, %v792_v61, %v788_v35  ;;  %v903_v49 = vmul.f32 %v1742_v36, %v902_v31  ;;  %v680_v0 = vmul.f32 1.442695, %v620_v32  ;;  %v708_v46 = vadd.f32 1.0, %v1746_v40  ;;  %vm2421_vm8 = vmor %vm1130_vm2, %vm1131_vm5 }
 0x100   : > { %v2403_v43 = vmul.f32 %v793_v59, %v564_v10  ;;  %v1127_v45 = vsub.f32 1.0, %v1126_v23  ;;  %1749 = vpow2.f32 %v650_v33  ;;  %v613_v5 = vsub.f32 0.0, %v2397_v34  ;;  %v515_v23 = vpop.f32.mrf.mxu1 }
 0x101   : > { %v1748_v48 = vpop.eup %1747  ;;  %v904_v29 = vadd.f32 %v1742_v36, %v903_v49  ;;  %1751 = vpow2.f32 %v680_v0  ;;  %v572_v52 = vmax.f32 %v2272_v51, 0.0  ;;  %v587_v54 = vmax.f32 %v2275_v38, 0.0  ;;  %v495_v51 = vpop.f32.mrf.mxu0 }
 0x102   : > { %1236 = vst [vmem:[%s2031_s12 + $0x20] sm:$0xff] %v2403_v43  ;;  %v1128_v50 = vmul.f32 %v1744_v30, %v1127_v45  ;;  %1753 = vrcp.f32 %v708_v46  ;;  %v1137_v58 = vor.u32 1.1754944e-38, %v1136_v39  ;;  %vm1135_vm9 = vcmp.eq.f32.partialorder %v1134_v21, 8.507059e+37  ;;  %v552_v0 = vpop.f32.mrf.mxu3 }
 0x103   : > { %v908_v44 = vsel %vm2407_vm6, %v1742_v36, %v904_v29  ;;  %v2425_v60 = vadd.f32 1.0, %v1748_v48  ;;  %v666_v2 = vmul.f32 1.442695, %v613_v5  ;;  %v580_v1 = vmax.f32 %v2326_v42, 0.0 }
 0x104   : > { %v913_v12 = vsel %vm910_vm7, %v912_v16, %v908_v44  ;;  %v1129_v47 = vadd.f32 %v1744_v30, %v1128_v50  ;;  %v1029_v25 = vand.u32 2147483647, %v708_v46  ;;  %v2438_v26 = vadd.f32 %v1935_v22, %v495_v51 }
 0x105   : > { %v2427_v53 = vmul.f32 %v913_v12, %v572_v52  ;;  %1755 = vrcp.f32 %v2425_v60  ;;  %v1031_v8 = vand.u32 2147483648, %v708_v46  ;;  %v804_v15 = vand.u32 2147483647, %v2425_v60  ;;  %v2486_v52 = vld [vmem:[%s2859_s2] ss:$0 sm:$0xff] }
 0x106   : > { %v1750_v3 = vpop.eup %1749  ;;  %v1133_v38 = vsel %vm2421_vm8, %v1744_v30, %v1129_v47  ;;  %1757 = vpow2.f32 %v666_v2  ;;  %v806_v36 = vand.u32 2147483648, %v2425_v60  ;;  %vm1025_vm10 = vweird.f32 %v708_v46 }
 0x107   : > { %v1752_v10 = vpop.eup %1751  ;;  %1244 = vst [vmem:[%s2031_s12 + $0x60] sm:$0xff] %v2427_v53  ;;  %v1138_v6 = vsel %vm1135_vm9, %v1137_v58, %v1133_v38  ;;  %v2435_v63 = vadd.f32 1.0, %v1750_v3  ;;  %v565_v22 = vmax.f32 %v2329_v37, 0.0  ;;  %v573_v14 = vmax.f32 %v2378_v11, 0.0  ;;  %v535_v38 = vpop.f32.mrf.mxu2 }
 0x108   : > { %v1754_v56 = vpop.eup %1753  ;;  %v2440_v57 = vmul.f32 %v1138_v6, %v587_v54  ;;  %v2442_v61 = vadd.f32 1.0, %v1752_v10  ;;  %v588_v28 = vmax.f32 %v2381_v24, 0.0  ;;  %vm2452_vm12 = vcmp.eq.f32.partialorder %v1029_v25, 8.507059e+37  ;;  %v517_v11 = vpop.f32.mrf.mxu1 }
 0x109   : > { %v1021_v19 = vmul.f32 %v1754_v56, %v708_v46  ;;  %1759 = vrcp.f32 %v2435_v63  ;;  %vm1026_vm11 = vweird.f32 %v1754_v56  ;;  %v1032_v20 = vor.u32 1.1754944e-38, %v1031_v8 }
 0x10a   : > { %1259 = vst [vmem:[%s2031_s12 + $0xd8] sm:$0xff] %v2440_v57  ;;  %1761 = vrcp.f32 %v2442_v61  ;;  %vm800_vm13 = vweird.f32 %v2425_v60  ;;  %v924_v21 = vand.u32 2147483647, %v2435_v63  ;;  %v598_v27 = vsub.f32 0.0, %v2438_v26  ;;  %vm2468_vm0 = vmor %vm1025_vm10, %vm1026_vm11 }
 0x10b   : > { %v1022_v17 = vsub.f32 1.0, %v1021_v19  ;;  %v1756_v16 = vpop.eup %1755  ;;  %vm2461_vm14 = vcmp.eq.f32.partialorder %v804_v15, 8.507059e+37  ;;  %v807_v35 = vor.u32 1.1754944e-38, %v806_v36  ;;  %vm920_vm15 = vweird.f32 %v2435_v63 }
 0x10c   : > { %v796_v31 = vmul.f32 %v1756_v16, %v2425_v60  ;;  %v1758_v39 = vpop.eup %1757  ;;  %v926_v40 = vand.u32 2147483648, %v2435_v63  ;;  %vm1145_vm1 = vweird.f32 %v2442_v61  ;;  %v1149_v59 = vand.u32 2147483647, %v2442_v61 }
 0x10d   : > { %v1023_v30 = vmul.f32 %v1754_v56, %v1022_v17  ;;  %v636_v49 = vmul.f32 1.442695, %v598_v27  ;;  %v1151_v29 = vand.u32 2147483648, %v2442_v61  ;;  %v2476_v5 = vadd.f32 1.0, %v1758_v39 }
 0x10e   : > { %v797_v48 = vsub.f32 1.0, %v796_v31  ;;  %vm801_vm2 = vweird.f32 %v1756_v16  ;;  %vm2479_vm3 = vcmp.eq.f32.partialorder %v924_v21, 8.507059e+37  ;;  %v2489_v44 = vadd.f32 %v2486_v52, %v515_v23 }
 0x10f   : > { %v1760_v7 = vpop.eup %1759  ;;  %v1024_v45 = vadd.f32 %v1754_v56, %v1023_v30  ;;  %1763 = vpow2.f32 %v636_v49  ;;  %v2495_v12 = vadd.f32 %v2486_v52, %v552_v0  ;;  %v927_v2 = vor.u32 1.1754944e-38, %v926_v40  ;;  %vm802_vm6 = vmor %vm800_vm13, %vm801_vm2 }
 0x110   : > { %v916_v46 = vmul.f32 %v1760_v7, %v2435_v63  ;;  %v1762_v54 = vpop.eup %1761  ;;  %v798_v58 = vmul.f32 %v1756_v16, %v797_v48  ;;  %1765 = vrcp.f32 %v2476_v5  ;;  %vm921_vm4 = vweird.f32 %v1760_v7 }
 0x111   : > { %v1028_v55 = vsel %vm2468_vm0, %v1754_v56, %v1024_v45  ;;  %v1141_v3 = vmul.f32 %v1762_v54, %v2442_v61  ;;  %vm2504_vm5 = vcmp.eq.f32.partialorder %v1149_v59, 8.507059e+37  ;;  %vm1146_vm7 = vweird.f32 %v1762_v54  ;;  %vm922_vm8 = vmor %vm920_vm15, %vm921_vm4  ;;  %v497_v45 = vpop.f32.mrf.mxu0 }
 0x112   : > { %v1033_v47 = vsel %vm2452_vm12, %v1032_v20, %v1028_v55  ;;  %v917_v51 = vsub.f32 1.0, %v916_v46  ;;  %v799_v6 = vadd.f32 %v1756_v16, %v798_v58  ;;  %v606_v19 = vsub.f32 0.0, %v2489_v44  ;;  %vm2531_vm10 = vmor %vm1145_vm1, %vm1146_vm7 }
 0x113   : > { %v2502_v10 = vmul.f32 %v1033_v47, %v580_v1  ;;  %v1142_v8 = vsub.f32 1.0, %v1141_v3  ;;  %v1152_v1 = vor.u32 1.1754944e-38, %v1151_v29  ;;  %v621_v15 = vsub.f32 0.0, %v2495_v12 }
 0x114   : > { %v918_v56 = vmul.f32 %v1760_v7, %v917_v51  ;;  %v803_v42 = vsel %vm802_vm6, %v1756_v16, %v799_v6  ;;  %v2516_v36 = vadd.f32 %v2486_v52, %v535_v38  ;;  %vm1040_vm9 = vweird.f32 %v2476_v5  ;;  %v537_v51 = vpop.f32.mrf.mxu2 }
 0x115   : > { %1252 = vst [vmem:[%s2031_s12 + $0xa0] sm:$0xff] %v2502_v10  ;;  %v1764_v17 = vpop.eup %1763  ;;  %v808_v60 = vsel %vm2461_vm14, %v807_v35, %v803_v42  ;;  %v1143_v20 = vmul.f32 %v1762_v54, %v1142_v8  ;;  %v1044_v30 = vand.u32 2147483647, %v2476_v5  ;;  %v1046_v63 = vand.u32 2147483648, %v2476_v5 }
 0x116   : > { %v919_v9 = vadd.f32 %v1760_v7, %v918_v56  ;;  %v1766_v16 = vpop.eup %1765  ;;  %v2526_v21 = vmul.f32 %v808_v60, %v565_v22  ;;  %v2537_v31 = vadd.f32 1.0, %v1764_v17  ;;  %v652_v22 = vmul.f32 1.442695, %v606_v19 }
 0x117   : > { %v1144_v35 = vadd.f32 %v1762_v54, %v1143_v20  ;;  %v1036_v37 = vmul.f32 %v1766_v16, %v2476_v5  ;;  %v682_v23 = vmul.f32 1.442695, %v621_v15  ;;  %v614_v39 = vsub.f32 0.0, %v2516_v36  ;;  %v555_v5 = vpop.f32.mrf.mxu3 }
 0x118   : > { %v923_v32 = vsel %vm922_vm8, %v1760_v7, %v919_v9  ;;  %1237 = vst [vmem:[%s2031_s12 + $0x28] sm:$0xff] %v2526_v21  ;;  %1767 = vrcp.f32 %v2537_v31  ;;  %vm1041_vm11 = vweird.f32 %v1766_v16  ;;  %v1047_v48 = vor.u32 1.1754944e-38, %v1046_v63 }
 0x119   : > { %v928_v61 = vsel %vm2479_vm3, %v927_v2, %v923_v32  ;;  %v1148_v40 = vsel %vm2531_vm10, %v1762_v54, %v1144_v35  ;;  %v1037_v59 = vsub.f32 1.0, %v1036_v37  ;;  %1769 = vpow2.f32 %v652_v22  ;;  %vm2562_vm12 = vmor %vm1040_vm9, %vm1041_vm11 }
 0x11a   : > { %v2548_v33 = vmul.f32 %v928_v61, %v573_v14  ;;  %v1153_v49 = vsel %vm2504_vm5, %v1152_v1, %v1148_v40  ;;  %1771 = vpow2.f32 %v682_v23  ;;  %vm1045_vm13 = vcmp.eq.f32.partialorder %v1044_v30, 8.507059e+37 }
 0x11b   : > { %v2558_v0 = vmul.f32 %v1153_v49, %v588_v28  ;;  %v1038_v7 = vmul.f32 %v1766_v16, %v1037_v59  ;;  %v668_v46 = vmul.f32 1.442695, %v614_v39  ;;  %v581_v28 = vmax.f32 %v2397_v34, 0.0 }
 0x11c   : > { %1245 = vst [vmem:[%s2031_s12 + $0x68] sm:$0xff] %v2548_v33  ;;  %v2570_v50 = vadd.f32 %v2486_v52, %v497_v45  ;;  %v2573_v54 = vadd.f32 %v2486_v52, %v517_v11  ;;  %v2579_v47 = vadd.f32 %v2486_v52, %v555_v5  ;;  %v819_v25 = vand.u32 2147483647, %v2537_v31 }
 0x11d   : > { %1260 = vst [vmem:[%s2031_s12 + $0xe0] sm:$0xff] %v2558_v0  ;;  %v1039_v29 = vadd.f32 %v1766_v16, %v1038_v7  ;;  %1773 = vpow2.f32 %v668_v46  ;;  %v821_v19 = vand.u32 2147483648, %v2537_v31  ;;  %v2590_v1 = vadd.f32 %v2486_v52, %v537_v51 }
 0x11e   : > { %v1768_v24 = vpop.eup %1767  ;;  %v599_v34 = vsub.f32 0.0, %v2570_v50  ;;  %v607_v56 = vsub.f32 0.0, %v2573_v54  ;;  %v622_v9 = vsub.f32 0.0, %v2579_v47  ;;  %v1274_v20 = vadd.f32 %v2316_v4, %v2403_v43 }
 0x11f   : > { %v1043_v55 = vsel %vm2562_vm12, %v1766_v16, %v1039_v29  ;;  %v811_v58 = vmul.f32 %v1768_v24, %v2537_v31  ;;  %v1770_v3 = vpop.eup %1769  ;;  %vm816_vm14 = vweird.f32 %v1768_v24  ;;  %v1315_v16 = vmul.f32 %v2403_v43, %v2403_v43  ;;  %v557_v46 = vpop.f32.mrf.mxu3 }
 0x120   : > { %v1048_v2 = vsel %vm1045_vm13, %v1047_v48, %v1043_v55  ;;  %v1772_v8 = vpop.eup %1771  ;;  %v2587_v42 = vadd.f32 1.0, %v1770_v3  ;;  %v638_v60 = vmul.f32 1.442695, %v599_v34  ;;  %v566_v27 = vmax.f32 %v2438_v26, 0.0 }
 0x121   : > { %v2582_v38 = vmul.f32 %v1048_v2, %v581_v28  ;;  %v812_v6 = vsub.f32 1.0, %v811_v58  ;;  %v2594_v17 = vadd.f32 1.0, %v1772_v8  ;;  %vm815_vm15 = vweird.f32 %v2537_v31 }
 0x122   : > { %1775 = vrcp.f32 %v2587_v42  ;;  %v654_v32 = vmul.f32 1.442695, %v607_v56  ;;  %v1316_v35 = vmul.f32 %v2526_v21, %v2526_v21  ;;  %vm817_vm0 = vmor %vm815_vm15, %vm816_vm14  ;;  %vm820_vm1 = vcmp.eq.f32.partialorder %v819_v25, 8.507059e+37 }
 0x123   : > { %1253 = vst [vmem:[%s2031_s12 + $0xa8] sm:$0xff] %v2582_v38  ;;  %v813_v15 = vmul.f32 %v1768_v24, %v812_v6  ;;  %v1774_v30 = vpop.eup %1773  ;;  %1777 = vrcp.f32 %v2594_v17  ;;  %v822_v4 = vor.u32 1.1754944e-38, %v821_v19  ;;  %v684_v26 = vmul.f32 1.442695, %v622_v9 }
 0x124   : > { %v2608_v37 = vadd.f32 1.0, %v1774_v30  ;;  %1779 = vpow2.f32 %v638_v60  ;;  %v615_v22 = vsub.f32 0.0, %v2590_v1  ;;  %v1346_v31 = vadd.f32 %v2332_v62, %v1315_v16 }
 0x125   : > { %v814_v63 = vadd.f32 %v1768_v24, %v813_v15  ;;  %v939_v23 = vand.u32 2147483647, %v2587_v42  ;;  %v941_v40 = vand.u32 2147483648, %v2587_v42  ;;  %v1166_v59 = vand.u32 2147483648, %v2594_v17 }
 0x126   : > { %1781 = vrcp.f32 %v2608_v37  ;;  %v2619_v7 = vadd.f32 %v1274_v20, %v2526_v21  ;;  %v2621_v45 = vadd.f32 %v1346_v31, %v1316_v35  ;;  %v574_v62 = vmax.f32 %v2489_v44, 0.0 }
 0x127   : > { %v818_v43 = vsel %vm817_vm0, %v1768_v24, %v814_v63  ;;  %1783 = vpow2.f32 %v654_v32  ;;  %vm935_vm2 = vweird.f32 %v2587_v42  ;;  %v589_v48 = vmax.f32 %v2495_v12, 0.0 }
 0x128   : > { %v823_v61 = vsel %vm820_vm1, %v822_v4, %v818_v43  ;;  %v1776_v49 = vpop.eup %1775  ;;  %1785 = vpow2.f32 %v684_v26  ;;  %v670_v29 = vmul.f32 1.442695, %v615_v22  ;;  %vm2629_vm3 = vcmp.eq.f32.partialorder %v939_v23, 8.507059e+37 }
 0x129   : > { %v2614_v39 = vmul.f32 %v823_v61, %v566_v27  ;;  %v1778_v11 = vpop.eup %1777  ;;  %v931_v14 = vmul.f32 %v1776_v49, %v2587_v42  ;;  %vm1160_vm4 = vweird.f32 %v2594_v17  ;;  %v1164_v44 = vand.u32 2147483647, %v2594_v17 }
 0x12a   : > { %v1156_v21 = vmul.f32 %v1778_v11, %v2594_v17  ;;  %v1780_v28 = vpop.eup %1779  ;;  %vm936_vm5 = vweird.f32 %v1776_v49  ;;  %v942_v55 = vor.u32 1.1754944e-38, %v941_v40  ;;  %v1167_v58 = vor.u32 1.1754944e-38, %v1166_v59 }
 0x12b   : > { %1238 = vst [vmem:[%s2031_s12 + $0x30] sm:$0xff] %v2614_v39  ;;  %v932_v5 = vsub.f32 1.0, %v931_v14  ;;  %vm1161_vm6 = vweird.f32 %v1778_v11  ;;  %v2636_v12 = vadd.f32 1.0, %v1780_v28  ;;  %v2639_v34 = vadd.f32 %v2486_v52, %v557_v46  ;;  %vm2645_vm8 = vmor %vm935_vm2, %vm936_vm5 }
 0x12c   : > { %v1782_v51 = vpop.eup %1781  ;;  %v1157_v2 = vsub.f32 1.0, %v1156_v21  ;;  %vm1055_vm7 = vweird.f32 %v2608_v37  ;;  %1787 = vpow2.f32 %v670_v29  ;;  %v1059_v15 = vand.u32 2147483647, %v2608_v37  ;;  %vm2655_vm9 = vmor %vm1160_vm4, %vm1161_vm6 }
 0x12d   : > { %v1784_v3 = vpop.eup %1783  ;;  %v933_v6 = vmul.f32 %v1776_v49, %v932_v5  ;;  %v1051_v25 = vmul.f32 %v1782_v51, %v2608_v37  ;;  %v1061_v52 = vand.u32 2147483648, %v2608_v37  ;;  %1789 = vrcp.f32 %v2636_v12 }
 0x12e   : > { %v1786_v56 = vpop.eup %1785  ;;  %v1158_v19 = vmul.f32 %v1778_v11, %v1157_v2  ;;  %vm1056_vm10 = vweird.f32 %v1782_v51  ;;  %v2659_v20 = vadd.f32 1.0, %v1784_v3  ;;  %vm1165_vm11 = vcmp.eq.f32.partialorder %v1164_v44, 8.507059e+37 }
 0x12f   : > { %v934_v60 = vadd.f32 %v1776_v49, %v933_v6  ;;  %v1052_v42 = vsub.f32 1.0, %v1051_v25  ;;  %v2661_v27 = vadd.f32 1.0, %v1786_v56  ;;  %v623_v30 = vsub.f32 0.0, %v2639_v34  ;;  %vm2676_vm12 = vmor %vm1055_vm7, %vm1056_vm10 }
 0x130   : > { %v1159_v16 = vadd.f32 %v1778_v11, %v1158_v19  ;;  %v582_v32 = vmax.f32 %v2516_v36, 0.0  ;;  %1791 = vrcp.f32 %v2659_v20  ;;  %v1317_v35 = vmul.f32 %v2614_v39, %v2614_v39 }
 0x131   : > { %v938_v63 = vsel %vm2645_vm8, %v1776_v49, %v934_v60  ;;  %v1053_v17 = vmul.f32 %v1782_v51, %v1052_v42  ;;  %v1062_v36 = vor.u32 1.1754944e-38, %v1061_v52  ;;  %vm1060_vm13 = vcmp.eq.f32.partialorder %v1059_v15, 8.507059e+37 }
 0x132   : > { %v943_v4 = vsel %vm2629_vm3, %v942_v55, %v938_v63  ;;  %v1163_v43 = vsel %vm2655_vm9, %v1778_v11, %v1159_v16  ;;  %v1788_v22 = vpop.eup %1787  ;;  %v567_v49 = vmax.f32 %v2570_v50, 0.0  ;;  %1793 = vrcp.f32 %v2661_v27 }
 0x133   : > { %v2680_v31 = vmul.f32 %v943_v4, %v574_v62  ;;  %v1168_v61 = vsel %vm1165_vm11, %v1167_v58, %v1163_v43  ;;  %v1054_v23 = vadd.f32 %v1782_v51, %v1053_v17  ;;  %v1790_v40 = vpop.eup %1789  ;;  %v686_v37 = vmul.f32 1.442695, %v623_v30 }
 0x134   : > { %v2682_v59 = vmul.f32 %v1168_v61, %v589_v48  ;;  %v1276_v11 = vadd.f32 %v2619_v7, %v2614_v39  ;;  %v826_v14 = vmul.f32 %v1790_v40, %v2636_v12  ;;  %v575_v29 = vmax.f32 %v2573_v54, 0.0 }
 0x135   : > { %1246 = vst [vmem:[%s2031_s12 + $0x70] sm:$0xff] %v2680_v31  ;;  %v1058_v62 = vsel %vm2676_vm12, %v1782_v51, %v1054_v23  ;;  %v2695_v48 = vadd.f32 %v2621_v45, %v1317_v35  ;;  %v834_v46 = vand.u32 2147483647, %v2636_v12  ;;  %v590_v39 = vmax.f32 %v2579_v47, 0.0  ;;  %v1804_v51 = vld [vmem:[%s2031_s12 + $0x50] sm:$0xff] }
 0x136   : > { %1261 = vst [vmem:[%s2031_s12 + $0xe8] sm:$0xff] %v2682_v59  ;;  %v1063_v50 = vsel %vm1060_vm13, %v1062_v36, %v1058_v62  ;;  %v1792_v7 = vpop.eup %1791  ;;  %v827_v21 = vsub.f32 1.0, %v826_v14  ;;  %v836_v44 = vand.u32 2147483648, %v2636_v12  ;;  %v2704_v28 = vadd.f32 1.0, %v1788_v22  ;;  %v1802_v62 = vld [vmem:[%s2031_s12 + $0x40] sm:$0xff] }
 0x137   : > { %v2701_v24 = vmul.f32 %v1063_v50, %v582_v32  ;;  %vm830_vm14 = vweird.f32 %v2636_v12  ;;  %v946_v54 = vmul.f32 %v1792_v7, %v2659_v20  ;;  %v954_v45 = vand.u32 2147483647, %v2659_v20 }
 0x138   : > { %1795 = vpow2.f32 %v686_v37  ;;  %v828_v5 = vmul.f32 %v1790_v40, %v827_v21  ;;  %vm831_vm15 = vweird.f32 %v1790_v40  ;;  %v956_v55 = vand.u32 2147483648, %v2659_v20  ;;  %v1794_v58 = vpop.eup %1793 }
 0x139   : > { %1254 = vst [vmem:[%s2031_s12 + $0xb0] sm:$0xff] %v2701_v24  ;;  %1797 = vrcp.f32 %v2704_v28  ;;  %vm2713_vm0 = vcmp.eq.f32.partialorder %v834_v46, 8.507059e+37  ;;  %v947_v2 = vsub.f32 1.0, %v946_v54  ;;  %v1179_v3 = vand.u32 2147483647, %v2661_v27  ;;  %vm832_vm2 = vmor %vm830_vm14, %vm831_vm15 }
 0x13a   : > { %v1181_v6 = vand.u32 2147483648, %v2661_v27  ;;  %v829_v25 = vadd.f32 %v1790_v40, %v828_v5  ;;  %v837_v56 = vor.u32 1.1754944e-38, %v836_v44  ;;  %vm950_vm1 = vweird.f32 %v2659_v20 }
 0x13b   : > { %v1171_v8 = vmul.f32 %v1794_v58, %v2661_v27  ;;  %v948_v19 = vmul.f32 %v1792_v7, %v947_v2  ;;  %vm951_vm3 = vweird.f32 %v1792_v7  ;;  %vm2723_vm4 = vcmp.eq.f32.partialorder %v954_v45, 8.507059e+37 }
 0x13c   : > { %vm1175_vm5 = vweird.f32 %v2661_v27  ;;  %v833_v52 = vsel %vm832_vm2, %v1790_v40, %v829_v25  ;;  %v957_v60 = vor.u32 1.1754944e-38, %v956_v55  ;;  %vm1176_vm6 = vweird.f32 %v1794_v58  ;;  %vm952_vm8 = vmor %vm950_vm1, %vm951_vm3 }
 0x13d   : > { %v1172_v9 = vsub.f32 1.0, %v1171_v8  ;;  %v838_v16 = vsel %vm2713_vm0, %v837_v56, %v833_v52  ;;  %v949_v30 = vadd.f32 %v1792_v7, %v948_v19  ;;  %vm2730_vm7 = vcmp.eq.f32.partialorder %v1179_v3, 8.507059e+37  ;;  %vm2741_vm10 = vmor %vm1175_vm5, %vm1176_vm6 }
 0x13e   : > { %v1796_v42 = vpop.eup %1795  ;;  %v1182_v63 = vor.u32 1.1754944e-38, %v1181_v6  ;;  %v1207_v17 = vmul.f32 %v838_v16, %v567_v49  ;;  %vm1070_vm9 = vweird.f32 %v2704_v28  ;;  %v1074_v22 = vand.u32 2147483647, %v2704_v28 }
 0x13f   : > { %v1798_v32 = vpop.eup %1797  ;;  %v1173_v35 = vmul.f32 %v1794_v58, %v1172_v9  ;;  %v2737_v4 = vadd.f32 1.0, %v1796_v42  ;;  %v953_v43 = vsel %vm952_vm8, %v1792_v7, %v949_v30  ;;  %v1076_v20 = vand.u32 2147483648, %v2704_v28 }
 0x140   : > { %v1066_v36 = vmul.f32 %v1798_v32, %v2704_v28  ;;  %1239 = vst [vmem:[%s2031_s12 + $0x38] sm:$0xff] %v1207_v17  ;;  %v1277_v61 = vadd.f32 %v1276_v11, %v1207_v17  ;;  %v1318_v23 = vmul.f32 %v1207_v17, %v1207_v17  ;;  %v958_v40 = vsel %vm2723_vm4, %v957_v60, %v953_v43  ;;  %v1803_v11 = vld [vmem:[%s2031_s12 + $0x48] sm:$0xff] }
 0x141   : > { %v1174_v49 = vadd.f32 %v1794_v58, %v1173_v35  ;;  %v1215_v27 = vmul.f32 %v958_v40, %v575_v29  ;;  %vm1071_vm11 = vweird.f32 %v1798_v32  ;;  %1799 = vrcp.f32 %v2737_v4 }
 0x142   : > { %v1067_v37 = vsub.f32 1.0, %v1066_v36  ;;  %v1319_v14 = vmul.f32 %v1802_v62, %v1802_v62  ;;  %v1278_v50 = vadd.f32 %v1802_v62, %v1277_v61  ;;  %v1349_v46 = vadd.f32 %v2695_v48, %v1318_v23  ;;  %vm2767_vm12 = vmor %vm1070_vm9, %vm1071_vm11 }
 0x143   : > { %v1178_v7 = vsel %vm2741_vm10, %v1794_v58, %v1174_v49  ;;  %v1320_v21 = vmul.f32 %v1803_v11, %v1803_v11  ;;  %1247 = vst [vmem:[%s2031_s12 + $0x78] sm:$0xff] %v1215_v27  ;;  %v1077_v55 = vor.u32 1.1754944e-38, %v1076_v20  ;;  %vm1075_vm13 = vcmp.eq.f32.partialorder %v1074_v22, 8.507059e+37  ;;  %v1805_v49 = vld [vmem:[%s2031_s12 + $0x80] sm:$0xff] }
 0x144   : > { %v1183_v29 = vsel %vm2730_vm7, %v1182_v63, %v1178_v7  ;;  %v1068_v44 = vmul.f32 %v1798_v32, %v1067_v37  ;;  %v1279_v54 = vadd.f32 %v1803_v11, %v1278_v50  ;;  %v1350_v45 = vadd.f32 %v1349_v46, %v1319_v14  ;;  %v1806_v14 = vld [vmem:[%s2031_s12 + $0x88] sm:$0xff] }
 0x145   : > { %v2762_v5 = vmul.f32 %v1183_v29, %v590_v39  ;;  %v1321_v2 = vmul.f32 %v1804_v51, %v1804_v51  ;;  %v1322_v3 = vmul.f32 %v2322_v41, %v2322_v41  ;;  %v1323_v28 = vmul.f32 %v2427_v53, %v2427_v53 }
 0x146   : > { %v1069_v58 = vadd.f32 %v1798_v32, %v1068_v44  ;;  %v1280_v47 = vadd.f32 %v1804_v51, %v1279_v54  ;;  %v1351_v6 = vadd.f32 %v1350_v45, %v1320_v21  ;;  %v583_v25 = vmax.f32 %v2590_v1, 0.0 }
 0x147   : > { %1262 = vst [vmem:[%s2031_s12 + $0xf0] sm:$0xff] %v2762_v5  ;;  %v1800_v39 = vpop.eup %1799  ;;  %vm1190_vm14 = vweird.f32 %v2737_v4  ;;  %v1194_v1 = vand.u32 2147483647, %v2737_v4  ;;  %v1196_v9 = vand.u32 2147483648, %v2737_v4  ;;  %v1324_v12 = vmul.f32 %v2548_v33, %v2548_v33 }
 0x148   : > { %v1073_v56 = vsel %vm2767_vm12, %v1798_v32, %v1069_v58  ;;  %v1352_v8 = vadd.f32 %v1351_v6, %v1321_v2  ;;  %v1281_v19 = vadd.f32 %v1280_v47, %v2322_v41  ;;  %v1186_v52 = vmul.f32 %v1800_v39, %v2737_v4 }
 0x149   : > { %v1078_v15 = vsel %vm1075_vm13, %v1077_v55, %v1073_v56  ;;  %vm1191_vm15 = vweird.f32 %v1800_v39  ;;  %v1834_v41 = vmov 0.0   ;;  %v1325_v35 = vmul.f32 %v2680_v31, %v2680_v31 }
 0x14a   : > { %v1223_v60 = vmul.f32 %v1078_v15, %v583_v25  ;;  %v1282_v42 = vadd.f32 %v1281_v19, %v2427_v53  ;;  %v1353_v16 = vadd.f32 %v1352_v8, %v1322_v3  ;;  %v1187_v30 = vsub.f32 1.0, %v1186_v52  ;;  %1268 = vst [vmem:[%s2785_s17] sm:$0x1] %v1834_v41  ;;  %vm1192_vm0 = vmor %vm1190_vm14, %vm1191_vm15  ;;  %v1808_v25 = vld [vmem:[%s2031_s12 + $0xc0] sm:$0xff]  ;;  %v1809_v19 = vld [vmem:[%s2031_s12 + $0xc8] sm:$0xff] }
 0x14b   : > { %1269 = vst [vmem:[%s2794_s24] sm:$0x1] %v1834_v41  ;;  %v591_v53 = vmax.f32 %v2639_v34, 0.0  ;;  %v1197_v43 = vor.u32 1.1754944e-38, %v1196_v9  ;;  %vm1195_vm1 = vcmp.eq.f32.partialorder %v1194_v1, 8.507059e+37  ;;  %v1326_v20 = vmul.f32 %v1215_v27, %v1215_v27 }
 0x14c   : > { %1255 = vst [vmem:[%s2031_s12 + $0xb8] sm:$0xff] %v1223_v60  ;;  %v1283_v63 = vadd.f32 %v1282_v42, %v2548_v33  ;;  %v1354_v32 = vadd.f32 %v1353_v16, %v1323_v28  ;;  %v1188_v17 = vmul.f32 %v1800_v39, %v1187_v30  ;;  %v1327_v37 = vmul.f32 %v1805_v49, %v1805_v49 }
 0x14d   : > { %v1328_v50 = vmul.f32 %v1806_v14, %v1806_v14  ;;  %v1331_v45 = vmul.f32 %v2502_v10, %v2502_v10  ;;  %v1332_v58 = vmul.f32 %v2582_v38, %v2582_v38  ;;  %v1333_v3 = vmul.f32 %v2701_v24, %v2701_v24 }
 0x14e   : > { %v1284_v26 = vadd.f32 %v1283_v63, %v2680_v31  ;;  %v1355_v36 = vadd.f32 %v1354_v32, %v1324_v12  ;;  %v1189_v22 = vadd.f32 %v1800_v39, %v1188_v17  ;;  %v1807_v31 = vld [vmem:[%s2031_s12 + $0x90] sm:$0xff]  ;;  %v1335_v56 = vmul.f32 %v1808_v25, %v1808_v25 }
 0x14f   : > { %v1329_v11 = vmul.f32 %v1807_v31, %v1807_v31  ;;  %v1336_v15 = vmul.f32 %v1809_v19, %v1809_v19  ;;  %v1339_v30 = vmul.f32 %v2558_v0, %v2558_v0  ;;  %v1340_v63 = vmul.f32 %v2682_v59, %v2682_v59 }
 0x150   : > { %v1285_v33 = vadd.f32 %v1284_v26, %v1215_v27  ;;  %v1356_v61 = vadd.f32 %v1355_v36, %v1325_v35  ;;  %v1193_v23 = vsel %vm1192_vm0, %v1800_v39, %v1189_v22  ;;  %v1330_v27 = vmul.f32 %v2383_v13, %v2383_v13 }
 0x151   : > { %v1198_v40 = vsel %vm1195_vm1, %v1197_v43, %v1193_v23  ;;  %v1334_v39 = vmul.f32 %v1223_v60, %v1223_v60 }
 0x152   : > { %v1286_v34 = vadd.f32 %v1805_v49, %v1285_v33  ;;  %v1357_v62 = vadd.f32 %v1356_v61, %v1326_v20  ;;  %v1231_v4 = vmul.f32 %v1198_v40, %v591_v53 }
 0x154   : > { %v1287_v46 = vadd.f32 %v1806_v14, %v1286_v34  ;;  %v1358_v7 = vadd.f32 %v1357_v62, %v1327_v37  ;;  %1263 = vst [vmem:[%s2031_s12 + $0xf8] sm:$0xff] %v1231_v4  ;;  %v1342_v43 = vmul.f32 %v1231_v4, %v1231_v4  ;;  %v1270_v37 = vld [vmem:[%s2785_s17] sm:$0x1] }
 0x155   : > { %v1310_v62 = vld [vmem:[%s2794_s24] sm:$0x1] }
 0x156   : > { %v1288_v21 = vadd.f32 %v1807_v31, %v1287_v46  ;;  %v1359_v29 = vadd.f32 %v1358_v7, %v1328_v50 }
 0x158   : > { %v1360_v44 = vadd.f32 %v1359_v29, %v1329_v11  ;;  %v1289_v54 = vadd.f32 %v1288_v21, %v2383_v13 }
 0x15a   : > { %v1290_v48 = vadd.f32 %v1289_v54, %v2502_v10  ;;  %v1361_v55 = vadd.f32 %v1360_v44, %v1330_v27 }
 0x15c   : > { %v1291_v51 = vadd.f32 %v1290_v48, %v2582_v38  ;;  %v1362_v2 = vadd.f32 %v1361_v55, %v1331_v45  ;;  %v1337_v38 = vmul.f32 %v2346_v18, %v2346_v18 }
 0x15e   : > { %v1292_v47 = vadd.f32 %v1291_v51, %v2701_v24  ;;  %v1363_v6 = vadd.f32 %v1362_v2, %v1332_v58  ;;  %v1338_v24 = vmul.f32 %v2440_v57, %v2440_v57 }
 0x160   : > { %v1293_v13 = vadd.f32 %v1292_v47, %v1223_v60  ;;  %v1364_v28 = vadd.f32 %v1363_v6, %v1333_v3 }
 0x162   : > { %v1294_v8 = vadd.f32 %v1808_v25, %v1293_v13  ;;  %v1365_v10 = vadd.f32 %v1364_v28, %v1334_v39 }
 0x164   : > { %v1295_v52 = vadd.f32 %v1809_v19, %v1294_v8  ;;  %v1366_v1 = vadd.f32 %v1365_v10, %v1335_v56 }
 0x166   : > { %v1296_v9 = vadd.f32 %v1295_v52, %v2346_v18  ;;  %v1367_v42 = vadd.f32 %v1366_v1, %v1336_v15  ;;  %v1341_v18 = vmul.f32 %v2762_v5, %v2762_v5 }
 0x168   : > { %v1368_v16 = vadd.f32 %v1367_v42, %v1337_v38  ;;  %v1297_v60 = vadd.f32 %v1296_v9, %v2440_v57 }
 0x16a   : > { %v1298_v41 = vadd.f32 %v1297_v60, %v2558_v0  ;;  %v1369_v12 = vadd.f32 %v1368_v16, %v1338_v24 }
 0x16c   : > { %v1299_v32 = vadd.f32 %v1298_v41, %v2682_v59  ;;  %v1370_v17 = vadd.f32 %v1369_v12, %v1339_v30 }
 0x16e   : > { %v1300_v35 = vadd.f32 %v1299_v32, %v2762_v5  ;;  %v1371_v53 = vadd.f32 %v1370_v17, %v1340_v63 }
 0x170   : > { %v1301_v57 = vadd.f32 %v1300_v35, %v1231_v4  ;;  %v1372_v26 = vadd.f32 %v1371_v53, %v1341_v18 }
 0x172   : > { %v1302_v36 = vrot.slane %v1301_v57, 4  ;;  %v1373_v0 = vadd.f32 %v1372_v26, %v1342_v43 }
 0x174   : > { %v1303_v22 = vadd.f32 %v1302_v36, %v1301_v57  ;;  %v1374_v33 = vrot.slane %v1373_v0, 4 }
 0x176   : > { %v1304_v20 = vrot.slane %v1303_v22, 2  ;;  %v1375_v59 = vadd.f32 %v1374_v33, %v1373_v0 }
 0x178   : > { %v1305_v61 = vadd.f32 %v1304_v20, %v1303_v22  ;;  %v1376_v23 = vrot.slane %v1375_v59, 2 }
 0x17a   : > { %v1306_v40 = vrot.slane %v1305_v61, 1  ;;  %v1377_v49 = vadd.f32 %v1376_v23, %v1375_v59 }
 0x17c   : > { %v1307_v34 = vadd.f32 %v1306_v40, %v1305_v61  ;;  %v1378_v5 = vrot.slane %v1377_v49, 1 }
 0x17e   : > { %v1308_v14 = vadd.f32 %v1307_v34, %v1270_v37  ;;  %v1379_v50 = vadd.f32 %v1378_v5, %v1377_v49 }
 0x180   : > { %1309 = vst [vmem:[%s2785_s17] sm:$0x1] %v1308_v14  ;;  %v1380_v4 = vadd.f32 %v1379_v50, %v1310_v62 }
 0x182   : > { %1381 = vst [vmem:[%s2794_s24] sm:$0x1] %v1380_v4 }
 0x183 PF: > { %s16_s20 = sadd.s32 1, %s1832_s20   ;;  %s2947_s18 = smov %s1828_s19 }
 0x184   : > { %p13_p5 = scmp.ge.s32.totalorder %s16_s20, 4   ;;  %s2948_s19 = smov %s2950_s21 }
 0x186   :  { %15 = sbr.rel (!%p13_p5) target bundleno = 2 (0x2), region = 90 }

</bundles_post_ra>
